<compile_context>
chip_gen: v6e
topology: v6e:2x2x1
jax: 0.10.0
libtpu: 0.0.40
codegen_flags: <defaults>
</compile_context>

<pallas_src>
import functools

import jax
import jax.numpy as jnp
import numpy as np
from jax import lax
from jax.experimental import pallas as pl
from jax.experimental.pallas import tpu as pltpu

# ----------------------------- configuration (small) ------------------------
B = 2
WAV_HIDDEN = 32          # stand-in for wav2vec2 hidden_size (1024)
TXT_HIDDEN = 24          # stand-in for BERT hidden_size (768)
P_SIZE = 16              # classifier_proj_size == mixer image_size (real: 256)
CHANNELS = 1
PATCH = 4
HP = P_SIZE // PATCH     # patches per side
NUM_PATCHES = HP * HP    # 16
PATCH_DIM = PATCH * PATCH * CHANNELS  # 16
DIM = 32                 # mixer hidden dim
DEPTH = 2
INNER_TOK = NUM_PATCHES * 4          # expansion_factor = 4 (token mixing, Conv1d k=1)
INNER_CHAN = int(DIM * 0.5)          # expansion_factor_token = 0.5 (channel mixing)
NUM_CLASSES = 9          # 7 emotion classes + 2 regression targets

AUG = WAV_HIDDEN + TXT_HIDDEN + 1    # augmented activation column [wav | txt | 1]
LANE = 128                           # lane width of packed param slab / padded output


# ------------------------------- math helpers --------------------------------
def _gelu(x):
    # exact (erf) GELU, matching torch.nn.GELU() default
    return 0.5 * x * (1.0 + lax.erf(x * 0.7071067811865476))


def _layernorm(x, gamma, beta, eps=1e-5):
    mean = jnp.mean(x, axis=-1, keepdims=True)
    var = jnp.mean(jnp.square(x - mean), axis=-1, keepdims=True)
    return (x - mean) * lax.rsqrt(var + eps) * gamma + beta


# --------------------------------- kernel ------------------------------------
def fused_mixer_kernel(layout, depth, u_ref, slab_ref, out_ref):
    """One batch element end-to-end:
       projection (bias folded) -> rank-1 image + patchify (selection matmuls)
       -> patch embed -> depth x (token-mix FF + channel-mix FF) -> LN -> mean
       -> classifier into a lane-dense (1, 128) output tile."""

    def g(name):
        r0, nr, nc = layout[name]          # static python ints
        return slab_ref[r0:r0 + nr, 0:nc]

    # --- wav/txt projections: block-diag weight, bias via augmented input ---
    proj = jnp.dot(g("w_proj"), u_ref[...],
                   preferred_element_type=jnp.float32)            # (2P, 1)
    wp = proj[0:P_SIZE, :]                                        # (P, 1) column
    tp = proj[P_SIZE:2 * P_SIZE, :]                               # (P, 1) column

    # --- outer-product image + einops patchify, fused (no transpose/reshape):
    # patches[n, q] = wp[h*PATCH+p1] * tp[w*PATCH+p2], n=h*HP+w, q=p1*PATCH+p2
    wp_sel = jnp.dot(g("lw"), wp * g("rw"), preferred_element_type=jnp.float32)
    tp_sel = jnp.dot(g("lt"), tp * g("rt"), preferred_element_type=jnp.float32)
    patches = wp_sel * tp_sel                                     # (N, PATCH_DIM)

    # --- patch embedding ---
    x = jnp.dot(patches, g("wpe"), preferred_element_type=jnp.float32) + g("bpe")

    for d in range(depth):
        # token mixing (PreNormResidual + Conv1d(k=1) FeedForward)
        xn = _layernorm(x, g(f"g1_{d}"), g(f"be1_{d}"))
        h = jnp.dot(g(f"wt1_{d}"), xn,
                    preferred_element_type=jnp.float32) + g(f"bt1_{d}")   # (inner_tok, D)
        h = _gelu(h)
        x = x + jnp.dot(g(f"wt2_{d}"), h,
                        preferred_element_type=jnp.float32) + g(f"bt2_{d}")

        # channel mixing (PreNormResidual + Linear FeedForward)
        xn = _layernorm(x, g(f"g2_{d}"), g(f"be2_{d}"))
        h = jnp.dot(xn, g(f"wc1_{d}"),
                    preferred_element_type=jnp.float32) + g(f"bc1_{d}")   # (N, inner_chan)
        h = _gelu(h)
        x = x + jnp.dot(h, g(f"wc2_{d}"),
                        preferred_element_type=jnp.float32) + g(f"bc2_{d}")

    x = _layernorm(x, g("gf"), g("bf"))
    pooled = jnp.mean(x, axis=0, keepdims=True)                   # (1, D)
    out_ref[...] = jnp.dot(pooled, g("wcls"),
                           preferred_element_type=jnp.float32) + g("bcls")  # (1, 128)


# --------------------------- host-side parameter packing ----------------------
def _selection_matrices():
    n = np.arange(NUM_PATCHES)
    i = np.arange(P_SIZE)
    q = np.arange(PATCH_DIM)
    # wp_sel = Lw @ (wp_col * Rw):  Lw[n,i]=[i//P==n//HP], Rw[i,q]=[i%P==q//P]
    lw = (i[None, :] // PATCH == n[:, None] // HP).astype(np.float32)
    rw = (i[:, None] % PATCH == q[None, :] // PATCH).astype(np.float32)
    # tp_sel = Lt @ (tp_col * Rt):  Lt[n,j]=[j//P==n%HP], Rt[j,q]=[j%P==q%P]
    lt = (i[None, :] // PATCH == n[:, None] % HP).astype(np.float32)
    rt = (i[:, None] % PATCH == q[None, :] % PATCH).astype(np.float32)
    return lw, rw, lt, rt


def pack_params(params):
    """Pack every weight / bias / LN param / constant selection matrix into a
    single (R, 128) f32 slab (one constant DMA, resident in VMEM across the grid).
    Returns (slab, layout) with layout[name] = (row_offset, n_rows, n_cols)."""
    def np2d(a):
        a = np.asarray(a, np.float32)
        return a if a.ndim == 2 else a[None, :]

    # projection: block-diag(Wpw, Wpt), biases folded as last column (input has a 1)
    w_proj = np.zeros((2 * P_SIZE, AUG), np.float32)
    w_proj[:P_SIZE, :WAV_HIDDEN] = np.asarray(params["wpwT"]).T
    w_proj[:P_SIZE, -1] = np.asarray(params["bpw"]).reshape(-1)
    w_proj[P_SIZE:, WAV_HIDDEN:WAV_HIDDEN + TXT_HIDDEN] = np.asarray(params["wptT"]).T
    w_proj[P_SIZE:, -1] = np.asarray(params["bpt"]).reshape(-1)

    lw, rw, lt, rt = _selection_matrices()

    # classifier padded to 128 lanes (lane-dense output store; extra cols are 0)
    wcls = np.zeros((DIM, LANE), np.float32)
    wcls[:, :NUM_CLASSES] = np.asarray(params["wclsT"])
    bcls = np.zeros((1, LANE), np.float32)
    bcls[:, :NUM_CLASSES] = np.asarray(params["bcls"])

    entries = [
        ("w_proj", w_proj),
        ("lw", lw), ("rw", rw), ("lt", lt), ("rt", rt),
        ("wpe", np2d(params["wpeT"])), ("bpe", np2d(params["bpe"])),
    ]
    for d in range(DEPTH):
        entries += [
            (f"g1_{d}", np2d(params["g1"][d])), (f"be1_{d}", np2d(params["be1"][d])),
            (f"wt1_{d}", np2d(params["wt1"][d])), (f"bt1_{d}", np2d(params["bt1"][d])),
            (f"wt2_{d}", np2d(params["wt2"][d])), (f"bt2_{d}", np2d(params["bt2"][d])),
            (f"g2_{d}", np2d(params["g2"][d])), (f"be2_{d}", np2d(params["be2"][d])),
            (f"wc1_{d}", np2d(params["wc1T"][d])), (f"bc1_{d}", np2d(params["bc1"][d])),
            (f"wc2_{d}", np2d(params["wc2T"][d])), (f"bc2_{d}", np2d(params["bc2"][d])),
        ]
    entries += [("gf", np2d(params["gf"])), ("bf", np2d(params["bf"])),
                ("wcls", wcls), ("bcls", bcls)]

    layout, blocks, row = {}, [], 0
    for name, arr in entries:
        nr, nc = arr.shape
        nr_pad = -(-nr // 8) * 8          # keep every slice 8-sublane aligned
        block = np.zeros((nr_pad, LANE), np.float32)
        block[:nr, :nc] = arr
        layout[name] = (row, nr, nc)
        blocks.append(block)
        row += nr_pad
    slab = jnp.asarray(np.concatenate(blocks, axis=0))
    return slab, layout


# ------------------------------ glue / wrapper --------------------------------
def mlp_mixer_forward(wav_feat, txt_feat, slab, layout):
    b = wav_feat.shape[0]
    ones = jnp.ones((b, 1), jnp.float32)
    u = jnp.concatenate([wav_feat, txt_feat, ones], axis=-1).reshape(b, AUG, 1)

    out = pl.pallas_call(
        functools.partial(fused_mixer_kernel, layout, DEPTH),
        out_shape=jax.ShapeDtypeStruct((b, 1, LANE), jnp.float32),
        grid=(b,),
        in_specs=[
            pl.BlockSpec((None, AUG, 1), lambda i: (i, 0, 0)),   # per-batch activations
            pl.BlockSpec(slab.shape, lambda i: (0, 0)),          # one packed param slab
        ],
        out_specs=pl.BlockSpec((None, 1, LANE), lambda i: (i, 0, 0)),  # lane-dense tile
        compiler_params=pltpu.CompilerParams(dimension_semantics=("parallel",)),
    )(u, slab)
    return out[:, 0, :NUM_CLASSES]


# ------------------------------ pure-JAX reference -----------------------------
def _rearrange_patches(img):
    # img: (B, H, W) with C=1 squeezed; einops 'b c (h p1)(w p2) -> b (h w)(p1 p2 c)'
    b = img.shape[0]
    x = img.reshape(b, CHANNELS, HP, PATCH, HP, PATCH)      # (B, C, h, p1, w, p2)
    x = x.transpose(0, 2, 4, 3, 5, 1)                       # (B, h, w, p1, p2, C)
    return x.reshape(b, NUM_PATCHES, PATCH_DIM)


def reference_forward(wav_feat, txt_feat, params):
    wp = wav_feat @ params["wpwT"] + params["bpw"]
    tp = txt_feat @ params["wptT"] + params["bpt"]
    img = wp[:, :, None] * tp[:, None, :]
    x = _rearrange_patches(img) @ params["wpeT"] + params["bpe"]
    for d in range(DEPTH):
        xn = _layernorm(x, params["g1"][d], params["be1"][d])
        h = _gelu(jnp.einsum("on,bnd->bod", params["wt1"][d], xn) + params["bt1"][d])
        x = x + jnp.einsum("no,bod->bnd", params["wt2"][d], h) + params["bt2"][d]
        xn = _layernorm(x, params["g2"][d], params["be2"][d])
        h = _gelu(xn @ params["wc1T"][d] + params["bc1"][d])
        x = x + h @ params["wc2T"][d] + params["bc2"][d]
    x = _layernorm(x, params["gf"], params["bf"])
    return x.mean(axis=1) @ params["wclsT"] + params["bcls"]


# ------------------------------- parameters ------------------------------------
def init_params(key):
    ks = jax.random.split(key, 16)

    def w(k, shape, scale=0.1):
        return (scale * jax.random.normal(k, shape)).astype(jnp.float32)

    p = {}
    # projectors (stored transposed: used as x @ W^T in the reference)
    p["wpwT"] = w(ks[0], (WAV_HIDDEN, P_SIZE))
    p["bpw"] = w(ks[1], (1, P_SIZE), 0.02)
    p["wptT"] = w(ks[2], (TXT_HIDDEN, P_SIZE))
    p["bpt"] = w(ks[3], (1, P_SIZE), 0.02)
    # mixer patch embedding
    p["wpeT"] = w(ks[4], (PATCH_DIM, DIM))
    p["bpe"] = w(ks[5], (1, DIM), 0.02)
    # per-depth stacks
    p["g1"] = jnp.ones((DEPTH, 1, DIM), jnp.float32)
    p["be1"] = jnp.zeros((DEPTH, 1, DIM), jnp.float32)
    p["wt1"] = w(ks[6], (DEPTH, INNER_TOK, NUM_PATCHES))   # Conv1d(k=1) weight (out,in)
    p["bt1"] = w(ks[7], (DEPTH, INNER_TOK, 1), 0.02)
    p["wt2"] = w(ks[8], (DEPTH, NUM_PATCHES, INNER_TOK))
    p["bt2"] = w(ks[9], (DEPTH, NUM_PATCHES, 1), 0.02)
    p["g2"] = jnp.ones((DEPTH, 1, DIM), jnp.float32)
    p["be2"] = jnp.zeros((DEPTH, 1, DIM), jnp.float32)
    p["wc1T"] = w(ks[10], (DEPTH, DIM, INNER_CHAN))
    p["bc1"] = w(ks[11], (DEPTH, 1, INNER_CHAN), 0.02)
    p["wc2T"] = w(ks[12], (DEPTH, INNER_CHAN, DIM))
    p["bc2"] = w(ks[13], (DEPTH, 1, DIM), 0.02)
    # final LN + classifier
    p["gf"] = jnp.ones((1, DIM), jnp.float32)
    p["bf"] = jnp.zeros((1, DIM), jnp.float32)
    p["wclsT"] = w(ks[14], (DIM, NUM_CLASSES))
    p["bcls"] = w(ks[15], (1, NUM_CLASSES), 0.02)
    return p


# ----------------------------------- main ---------------------------------------
if __name__ == "__main__":
    key = jax.random.PRNGKey(0)
    kp, kw, kt = jax.random.split(key, 3)
    params = init_params(kp)
    slab, layout = pack_params(params)

    # Stand-ins for the pooled Wav2Vec2 feature and the BERT [CLS] feature.
    pooled_wav_feat = jax.random.normal(kw, (B, WAV_HIDDEN), dtype=jnp.float32)
    txt_cls_feat = jax.random.normal(kt, (B, TXT_HIDDEN), dtype=jnp.float32)

    logits = mlp_mixer_forward(pooled_wav_feat, txt_cls_feat, slab, layout)
    logits = jax.block_until_ready(logits)

    with jax.default_matmul_precision("highest"):
        ref = jax.block_until_ready(
            reference_forward(pooled_wav_feat, txt_cls_feat, params))

    np.testing.assert_allclose(np.asarray(logits), np.asarray(ref),
                               rtol=2e-2, atol=5e-3)

    # mirror the module's head split (cls vs regression logits)
    cls_logits = logits[:, :-2]
    reg_logits = logits[:, -2:]
    assert cls_logits.shape == (B, NUM_CLASSES - 2)
    assert reg_logits.shape == (B, 2)

    print("KERNEL_OK")
</pallas_src>

<mosaic_0001>
module attributes {stable_mosaic.version = 11 : i64} {
  func.func @fused_mixer_kernel(%arg0: i32, %arg1: memref<1x57x1xf32, #tpu.memory_space<vmem>>, %arg2: memref<688x128xf32, #tpu.memory_space<vmem>>, %arg3: memref<1x1x128xf32, #tpu.memory_space<vmem>>) attributes {dimension_semantics = [#tpu.dimension_semantics<parallel>], iteration_bounds = array<i64: 2>, scalar_prefetch = 0 : i64, scratch_operands = 0 : i64, tpu.core_type = #tpu.core_type<tc>, window_params = [{transform_indices = @transform_0, window_bounds = array<i64: 1, 57, 1>}, {pipeline_mode = #tpu.pipeline_mode<synchronous>, transform_indices = @transform_1, window_bounds = array<i64: 688, 128>}, {transform_indices = @transform_2, window_bounds = array<i64: 1, 1, 128>}]} {
    %c0 = arith.constant 0 : index
    %c0_0 = arith.constant 0 : index
    %0 = vector.load %arg2[%c0, %c0_0] : memref<688x128xf32, #tpu.memory_space<vmem>>, vector<32x57xf32>
    %c0_1 = arith.constant 0 : index
    %c0_2 = arith.constant 0 : index
    %c0_3 = arith.constant 0 : index
    %1 = vector.load %arg1[%c0_1, %c0_2, %c0_3] : memref<1x57x1xf32, #tpu.memory_space<vmem>>, vector<1x57x1xf32>
    %2 = vector.shape_cast %1 : vector<1x57x1xf32> to vector<57x1xf32>
    %cst = arith.constant dense<0.000000e+00> : vector<32x1xf32>
    %3 = tpu.matmul %0, %2, %cst {dimension_numbers = #tpu.dot_dimension_numbers<[1], [0], [0], [1], [0, 0, 1, 1], [], []>} : vector<32x57xf32>, vector<57x1xf32>, vector<32x1xf32> -> vector<32x1xf32>
    %4 = vector.extract_strided_slice %3 {offsets = [0, 0], sizes = [16, 1], strides = [1, 1]} : vector<32x1xf32> to vector<16x1xf32>
    %5 = vector.extract_strided_slice %3 {offsets = [16, 0], sizes = [16, 1], strides = [1, 1]} : vector<32x1xf32> to vector<16x1xf32>
    %c32 = arith.constant 32 : index
    %c0_4 = arith.constant 0 : index
    %6 = vector.load %arg2[%c32, %c0_4] : memref<688x128xf32, #tpu.memory_space<vmem>>, vector<16x16xf32>
    %c48 = arith.constant 48 : index
    %c0_5 = arith.constant 0 : index
    %7 = vector.load %arg2[%c48, %c0_5] : memref<688x128xf32, #tpu.memory_space<vmem>>, vector<16x16xf32>
    %8 = vector.broadcast %4 : vector<16x1xf32> to vector<16x16xf32>
    %9 = arith.mulf %8, %7 : vector<16x16xf32>
    %cst_6 = arith.constant dense<0.000000e+00> : vector<16x16xf32>
    %10 = tpu.matmul %6, %9, %cst_6 {dimension_numbers = #tpu.dot_dimension_numbers<[1], [0], [0], [1], [0, 0, 1, 1], [], []>} : vector<16x16xf32>, vector<16x16xf32>, vector<16x16xf32> -> vector<16x16xf32>
    %c64 = arith.constant 64 : index
    %c0_7 = arith.constant 0 : index
    %11 = vector.load %arg2[%c64, %c0_7] : memref<688x128xf32, #tpu.memory_space<vmem>>, vector<16x16xf32>
    %c80 = arith.constant 80 : index
    %c0_8 = arith.constant 0 : index
    %12 = vector.load %arg2[%c80, %c0_8] : memref<688x128xf32, #tpu.memory_space<vmem>>, vector<16x16xf32>
    %13 = vector.broadcast %5 : vector<16x1xf32> to vector<16x16xf32>
    %14 = arith.mulf %13, %12 : vector<16x16xf32>
    %cst_9 = arith.constant dense<0.000000e+00> : vector<16x16xf32>
    %15 = tpu.matmul %11, %14, %cst_9 {dimension_numbers = #tpu.dot_dimension_numbers<[1], [0], [0], [1], [0, 0, 1, 1], [], []>} : vector<16x16xf32>, vector<16x16xf32>, vector<16x16xf32> -> vector<16x16xf32>
    %16 = arith.mulf %10, %15 : vector<16x16xf32>
    %c96 = arith.constant 96 : index
    %c0_10 = arith.constant 0 : index
    %17 = vector.load %arg2[%c96, %c0_10] : memref<688x128xf32, #tpu.memory_space<vmem>>, vector<16x32xf32>
    %cst_11 = arith.constant dense<0.000000e+00> : vector<16x32xf32>
    %18 = tpu.matmul %16, %17, %cst_11 {dimension_numbers = #tpu.dot_dimension_numbers<[1], [0], [0], [1], [0, 0, 1, 1], [], []>} : vector<16x16xf32>, vector<16x32xf32>, vector<16x32xf32> -> vector<16x32xf32>
    %c112 = arith.constant 112 : index
    %c0_12 = arith.constant 0 : index
    %19 = vector.load %arg2[%c112, %c0_12] : memref<688x128xf32, #tpu.memory_space<vmem>>, vector<1x32xf32>
    %20 = vector.broadcast %19 : vector<1x32xf32> to vector<16x32xf32>
    %21 = arith.addf %18, %20 : vector<16x32xf32>
    %c120 = arith.constant 120 : index
    %c0_13 = arith.constant 0 : index
    %22 = vector.load %arg2[%c120, %c0_13] : memref<688x128xf32, #tpu.memory_space<vmem>>, vector<1x32xf32>
    %c128 = arith.constant 128 : index
    %c0_14 = arith.constant 0 : index
    %23 = vector.load %arg2[%c128, %c0_14] : memref<688x128xf32, #tpu.memory_space<vmem>>, vector<1x32xf32>
    %cst_15 = arith.constant dense<0.000000e+00> : vector<16xf32>
    %24 = vector.multi_reduction <add>, %21, %cst_15 [1] : vector<16x32xf32> to vector<16xf32>
    %25 = vector.shape_cast %24 : vector<16xf32> to vector<16x1xf32>
    %cst_16 = arith.constant 3.200000e+01 : f32
    %26 = vector.broadcast %cst_16 : f32 to vector<16x1xf32>
    %27 = arith.divf %25, %26 : vector<16x1xf32>
    %28 = vector.broadcast %27 : vector<16x1xf32> to vector<16x32xf32>
    %29 = arith.subf %21, %28 : vector<16x32xf32>
    %30 = arith.mulf %29, %29 : vector<16x32xf32>
    %cst_17 = arith.constant dense<0.000000e+00> : vector<16xf32>
    %31 = vector.multi_reduction <add>, %30, %cst_17 [1] : vector<16x32xf32> to vector<16xf32>
    %32 = vector.shape_cast %31 : vector<16xf32> to vector<16x1xf32>
    %cst_18 = arith.constant 3.200000e+01 : f32
    %33 = vector.broadcast %cst_18 : f32 to vector<16x1xf32>
    %34 = arith.divf %32, %33 : vector<16x1xf32>
    %35 = vector.broadcast %27 : vector<16x1xf32> to vector<16x32xf32>
    %36 = arith.subf %21, %35 : vector<16x32xf32>
    %cst_19 = arith.constant 9.99999974E-6 : f32
    %37 = vector.broadcast %cst_19 : f32 to vector<16x1xf32>
    %38 = arith.addf %34, %37 : vector<16x1xf32>
    %39 = math.rsqrt %38 : vector<16x1xf32>
    %40 = vector.broadcast %39 : vector<16x1xf32> to vector<16x32xf32>
    %41 = arith.mulf %36, %40 : vector<16x32xf32>
    %42 = vector.broadcast %22 : vector<1x32xf32> to vector<16x32xf32>
    %43 = arith.mulf %41, %42 : vector<16x32xf32>
    %44 = vector.broadcast %23 : vector<1x32xf32> to vector<16x32xf32>
    %45 = arith.addf %43, %44 : vector<16x32xf32>
    %c136 = arith.constant 136 : index
    %c0_20 = arith.constant 0 : index
    %46 = vector.load %arg2[%c136, %c0_20] : memref<688x128xf32, #tpu.memory_space<vmem>>, vector<64x16xf32>
    %cst_21 = arith.constant dense<0.000000e+00> : vector<64x32xf32>
    %47 = tpu.matmul %46, %45, %cst_21 {dimension_numbers = #tpu.dot_dimension_numbers<[1], [0], [0], [1], [0, 0, 1, 1], [], []>} : vector<64x16xf32>, vector<16x32xf32>, vector<64x32xf32> -> vector<64x32xf32>
    %c200 = arith.constant 200 : index
    %c0_22 = arith.constant 0 : index
    %48 = vector.load %arg2[%c200, %c0_22] : memref<688x128xf32, #tpu.memory_space<vmem>>, vector<64x1xf32>
    %49 = vector.broadcast %48 : vector<64x1xf32> to vector<64x32xf32>
    %50 = arith.addf %47, %49 : vector<64x32xf32>
    %cst_23 = arith.constant 5.000000e-01 : f32
    %51 = vector.broadcast %cst_23 : f32 to vector<64x32xf32>
    %52 = arith.mulf %51, %50 : vector<64x32xf32>
    %cst_24 = arith.constant 0.707106769 : f32
    %53 = vector.broadcast %cst_24 : f32 to vector<64x32xf32>
    %54 = arith.mulf %50, %53 : vector<64x32xf32>
    %55 = math.erf %54 : vector<64x32xf32>
    %cst_25 = arith.constant 1.000000e+00 : f32
    %56 = vector.broadcast %cst_25 : f32 to vector<64x32xf32>
    %57 = arith.addf %56, %55 : vector<64x32xf32>
    %58 = arith.mulf %52, %57 : vector<64x32xf32>
    %c264 = arith.constant 264 : index
    %c0_26 = arith.constant 0 : index
    %59 = vector.load %arg2[%c264, %c0_26] : memref<688x128xf32, #tpu.memory_space<vmem>>, vector<16x64xf32>
    %cst_27 = arith.constant dense<0.000000e+00> : vector<16x32xf32>
    %60 = tpu.matmul %59, %58, %cst_27 {dimension_numbers = #tpu.dot_dimension_numbers<[1], [0], [0], [1], [0, 0, 1, 1], [], []>} : vector<16x64xf32>, vector<64x32xf32>, vector<16x32xf32> -> vector<16x32xf32>
    %61 = arith.addf %21, %60 : vector<16x32xf32>
    %c280 = arith.constant 280 : index
    %c0_28 = arith.constant 0 : index
    %62 = vector.load %arg2[%c280, %c0_28] : memref<688x128xf32, #tpu.memory_space<vmem>>, vector<16x1xf32>
    %63 = vector.broadcast %62 : vector<16x1xf32> to vector<16x32xf32>
    %64 = arith.addf %61, %63 : vector<16x32xf32>
    %c296 = arith.constant 296 : index
    %c0_29 = arith.constant 0 : index
    %65 = vector.load %arg2[%c296, %c0_29] : memref<688x128xf32, #tpu.memory_space<vmem>>, vector<1x32xf32>
    %c304 = arith.constant 304 : index
    %c0_30 = arith.constant 0 : index
    %66 = vector.load %arg2[%c304, %c0_30] : memref<688x128xf32, #tpu.memory_space<vmem>>, vector<1x32xf32>
    %cst_31 = arith.constant dense<0.000000e+00> : vector<16xf32>
    %67 = vector.multi_reduction <add>, %64, %cst_31 [1] : vector<16x32xf32> to vector<16xf32>
    %68 = vector.shape_cast %67 : vector<16xf32> to vector<16x1xf32>
    %cst_32 = arith.constant 3.200000e+01 : f32
    %69 = vector.broadcast %cst_32 : f32 to vector<16x1xf32>
    %70 = arith.divf %68, %69 : vector<16x1xf32>
    %71 = vector.broadcast %70 : vector<16x1xf32> to vector<16x32xf32>
    %72 = arith.subf %64, %71 : vector<16x32xf32>
    %73 = arith.mulf %72, %72 : vector<16x32xf32>
    %cst_33 = arith.constant dense<0.000000e+00> : vector<16xf32>
    %74 = vector.multi_reduction <add>, %73, %cst_33 [1] : vector<16x32xf32> to vector<16xf32>
    %75 = vector.shape_cast %74 : vector<16xf32> to vector<16x1xf32>
    %cst_34 = arith.constant 3.200000e+01 : f32
    %76 = vector.broadcast %cst_34 : f32 to vector<16x1xf32>
    %77 = arith.divf %75, %76 : vector<16x1xf32>
    %78 = vector.broadcast %70 : vector<16x1xf32> to vector<16x32xf32>
    %79 = arith.subf %64, %78 : vector<16x32xf32>
    %cst_35 = arith.constant 9.99999974E-6 : f32
    %80 = vector.broadcast %cst_35 : f32 to vector<16x1xf32>
    %81 = arith.addf %77, %80 : vector<16x1xf32>
    %82 = math.rsqrt %81 : vector<16x1xf32>
    %83 = vector.broadcast %82 : vector<16x1xf32> to vector<16x32xf32>
    %84 = arith.mulf %79, %83 : vector<16x32xf32>
    %85 = vector.broadcast %65 : vector<1x32xf32> to vector<16x32xf32>
    %86 = arith.mulf %84, %85 : vector<16x32xf32>
    %87 = vector.broadcast %66 : vector<1x32xf32> to vector<16x32xf32>
    %88 = arith.addf %86, %87 : vector<16x32xf32>
    %c312 = arith.constant 312 : index
    %c0_36 = arith.constant 0 : index
    %89 = vector.load %arg2[%c312, %c0_36] : memref<688x128xf32, #tpu.memory_space<vmem>>, vector<32x16xf32>
    %cst_37 = arith.constant dense<0.000000e+00> : vector<16x16xf32>
    %90 = tpu.matmul %88, %89, %cst_37 {dimension_numbers = #tpu.dot_dimension_numbers<[1], [0], [0], [1], [0, 0, 1, 1], [], []>} : vector<16x32xf32>, vector<32x16xf32>, vector<16x16xf32> -> vector<16x16xf32>
    %c344 = arith.constant 344 : index
    %c0_38 = arith.constant 0 : index
    %91 = vector.load %arg2[%c344, %c0_38] : memref<688x128xf32, #tpu.memory_space<vmem>>, vector<1x16xf32>
    %92 = vector.broadcast %91 : vector<1x16xf32> to vector<16x16xf32>
    %93 = arith.addf %90, %92 : vector<16x16xf32>
    %cst_39 = arith.constant 5.000000e-01 : f32
    %94 = vector.broadcast %cst_39 : f32 to vector<16x16xf32>
    %95 = arith.mulf %94, %93 : vector<16x16xf32>
    %cst_40 = arith.constant 0.707106769 : f32
    %96 = vector.broadcast %cst_40 : f32 to vector<16x16xf32>
    %97 = arith.mulf %93, %96 : vector<16x16xf32>
    %98 = math.erf %97 : vector<16x16xf32>
    %cst_41 = arith.constant 1.000000e+00 : f32
    %99 = vector.broadcast %cst_41 : f32 to vector<16x16xf32>
    %100 = arith.addf %99, %98 : vector<16x16xf32>
    %101 = arith.mulf %95, %100 : vector<16x16xf32>
    %c352 = arith.constant 352 : index
    %c0_42 = arith.constant 0 : index
    %102 = vector.load %arg2[%c352, %c0_42] : memref<688x128xf32, #tpu.memory_space<vmem>>, vector<16x32xf32>
    %cst_43 = arith.constant dense<0.000000e+00> : vector<16x32xf32>
    %103 = tpu.matmul %101, %102, %cst_43 {dimension_numbers = #tpu.dot_dimension_numbers<[1], [0], [0], [1], [0, 0, 1, 1], [], []>} : vector<16x16xf32>, vector<16x32xf32>, vector<16x32xf32> -> vector<16x32xf32>
    %104 = arith.addf %64, %103 : vector<16x32xf32>
    %c368 = arith.constant 368 : index
    %c0_44 = arith.constant 0 : index
    %105 = vector.load %arg2[%c368, %c0_44] : memref<688x128xf32, #tpu.memory_space<vmem>>, vector<1x32xf32>
    %106 = vector.broadcast %105 : vector<1x32xf32> to vector<16x32xf32>
    %107 = arith.addf %104, %106 : vector<16x32xf32>
    %c376 = arith.constant 376 : index
    %c0_45 = arith.constant 0 : index
    %108 = vector.load %arg2[%c376, %c0_45] : memref<688x128xf32, #tpu.memory_space<vmem>>, vector<1x32xf32>
    %c384 = arith.constant 384 : index
    %c0_46 = arith.constant 0 : index
    %109 = vector.load %arg2[%c384, %c0_46] : memref<688x128xf32, #tpu.memory_space<vmem>>, vector<1x32xf32>
    %cst_47 = arith.constant dense<0.000000e+00> : vector<16xf32>
    %110 = vector.multi_reduction <add>, %107, %cst_47 [1] : vector<16x32xf32> to vector<16xf32>
    %111 = vector.shape_cast %110 : vector<16xf32> to vector<16x1xf32>
    %cst_48 = arith.constant 3.200000e+01 : f32
    %112 = vector.broadcast %cst_48 : f32 to vector<16x1xf32>
    %113 = arith.divf %111, %112 : vector<16x1xf32>
    %114 = vector.broadcast %113 : vector<16x1xf32> to vector<16x32xf32>
    %115 = arith.subf %107, %114 : vector<16x32xf32>
    %116 = arith.mulf %115, %115 : vector<16x32xf32>
    %cst_49 = arith.constant dense<0.000000e+00> : vector<16xf32>
    %117 = vector.multi_reduction <add>, %116, %cst_49 [1] : vector<16x32xf32> to vector<16xf32>
    %118 = vector.shape_cast %117 : vector<16xf32> to vector<16x1xf32>
    %cst_50 = arith.constant 3.200000e+01 : f32
    %119 = vector.broadcast %cst_50 : f32 to vector<16x1xf32>
    %120 = arith.divf %118, %119 : vector<16x1xf32>
    %121 = vector.broadcast %113 : vector<16x1xf32> to vector<16x32xf32>
    %122 = arith.subf %107, %121 : vector<16x32xf32>
    %cst_51 = arith.constant 9.99999974E-6 : f32
    %123 = vector.broadcast %cst_51 : f32 to vector<16x1xf32>
    %124 = arith.addf %120, %123 : vector<16x1xf32>
    %125 = math.rsqrt %124 : vector<16x1xf32>
    %126 = vector.broadcast %125 : vector<16x1xf32> to vector<16x32xf32>
    %127 = arith.mulf %122, %126 : vector<16x32xf32>
    %128 = vector.broadcast %108 : vector<1x32xf32> to vector<16x32xf32>
    %129 = arith.mulf %127, %128 : vector<16x32xf32>
    %130 = vector.broadcast %109 : vector<1x32xf32> to vector<16x32xf32>
    %131 = arith.addf %129, %130 : vector<16x32xf32>
    %c392 = arith.constant 392 : index
    %c0_52 = arith.constant 0 : index
    %132 = vector.load %arg2[%c392, %c0_52] : memref<688x128xf32, #tpu.memory_space<vmem>>, vector<64x16xf32>
    %cst_53 = arith.constant dense<0.000000e+00> : vector<64x32xf32>
    %133 = tpu.matmul %132, %131, %cst_53 {dimension_numbers = #tpu.dot_dimension_numbers<[1], [0], [0], [1], [0, 0, 1, 1], [], []>} : vector<64x16xf32>, vector<16x32xf32>, vector<64x32xf32> -> vector<64x32xf32>
    %c456 = arith.constant 456 : index
    %c0_54 = arith.constant 0 : index
    %134 = vector.load %arg2[%c456, %c0_54] : memref<688x128xf32, #tpu.memory_space<vmem>>, vector<64x1xf32>
    %135 = vector.broadcast %134 : vector<64x1xf32> to vector<64x32xf32>
    %136 = arith.addf %133, %135 : vector<64x32xf32>
    %cst_55 = arith.constant 5.000000e-01 : f32
    %137 = vector.broadcast %cst_55 : f32 to vector<64x32xf32>
    %138 = arith.mulf %137, %136 : vector<64x32xf32>
    %cst_56 = arith.constant 0.707106769 : f32
    %139 = vector.broadcast %cst_56 : f32 to vector<64x32xf32>
    %140 = arith.mulf %136, %139 : vector<64x32xf32>
    %141 = math.erf %140 : vector<64x32xf32>
    %cst_57 = arith.constant 1.000000e+00 : f32
    %142 = vector.broadcast %cst_57 : f32 to vector<64x32xf32>
    %143 = arith.addf %142, %141 : vector<64x32xf32>
    %144 = arith.mulf %138, %143 : vector<64x32xf32>
    %c520 = arith.constant 520 : index
    %c0_58 = arith.constant 0 : index
    %145 = vector.load %arg2[%c520, %c0_58] : memref<688x128xf32, #tpu.memory_space<vmem>>, vector<16x64xf32>
    %cst_59 = arith.constant dense<0.000000e+00> : vector<16x32xf32>
    %146 = tpu.matmul %145, %144, %cst_59 {dimension_numbers = #tpu.dot_dimension_numbers<[1], [0], [0], [1], [0, 0, 1, 1], [], []>} : vector<16x64xf32>, vector<64x32xf32>, vector<16x32xf32> -> vector<16x32xf32>
    %147 = arith.addf %107, %146 : vector<16x32xf32>
    %c536 = arith.constant 536 : index
    %c0_60 = arith.constant 0 : index
    %148 = vector.load %arg2[%c536, %c0_60] : memref<688x128xf32, #tpu.memory_space<vmem>>, vector<16x1xf32>
    %149 = vector.broadcast %148 : vector<16x1xf32> to vector<16x32xf32>
    %150 = arith.addf %147, %149 : vector<16x32xf32>
    %c552 = arith.constant 552 : index
    %c0_61 = arith.constant 0 : index
    %151 = vector.load %arg2[%c552, %c0_61] : memref<688x128xf32, #tpu.memory_space<vmem>>, vector<1x32xf32>
    %c560 = arith.constant 560 : index
    %c0_62 = arith.constant 0 : index
    %152 = vector.load %arg2[%c560, %c0_62] : memref<688x128xf32, #tpu.memory_space<vmem>>, vector<1x32xf32>
    %cst_63 = arith.constant dense<0.000000e+00> : vector<16xf32>
    %153 = vector.multi_reduction <add>, %150, %cst_63 [1] : vector<16x32xf32> to vector<16xf32>
    %154 = vector.shape_cast %153 : vector<16xf32> to vector<16x1xf32>
    %cst_64 = arith.constant 3.200000e+01 : f32
    %155 = vector.broadcast %cst_64 : f32 to vector<16x1xf32>
    %156 = arith.divf %154, %155 : vector<16x1xf32>
    %157 = vector.broadcast %156 : vector<16x1xf32> to vector<16x32xf32>
    %158 = arith.subf %150, %157 : vector<16x32xf32>
    %159 = arith.mulf %158, %158 : vector<16x32xf32>
    %cst_65 = arith.constant dense<0.000000e+00> : vector<16xf32>
    %160 = vector.multi_reduction <add>, %159, %cst_65 [1] : vector<16x32xf32> to vector<16xf32>
    %161 = vector.shape_cast %160 : vector<16xf32> to vector<16x1xf32>
    %cst_66 = arith.constant 3.200000e+01 : f32
    %162 = vector.broadcast %cst_66 : f32 to vector<16x1xf32>
    %163 = arith.divf %161, %162 : vector<16x1xf32>
    %164 = vector.broadcast %156 : vector<16x1xf32> to vector<16x32xf32>
    %165 = arith.subf %150, %164 : vector<16x32xf32>
    %cst_67 = arith.constant 9.99999974E-6 : f32
    %166 = vector.broadcast %cst_67 : f32 to vector<16x1xf32>
    %167 = arith.addf %163, %166 : vector<16x1xf32>
    %168 = math.rsqrt %167 : vector<16x1xf32>
    %169 = vector.broadcast %168 : vector<16x1xf32> to vector<16x32xf32>
    %170 = arith.mulf %165, %169 : vector<16x32xf32>
    %171 = vector.broadcast %151 : vector<1x32xf32> to vector<16x32xf32>
    %172 = arith.mulf %170, %171 : vector<16x32xf32>
    %173 = vector.broadcast %152 : vector<1x32xf32> to vector<16x32xf32>
    %174 = arith.addf %172, %173 : vector<16x32xf32>
    %c568 = arith.constant 568 : index
    %c0_68 = arith.constant 0 : index
    %175 = vector.load %arg2[%c568, %c0_68] : memref<688x128xf32, #tpu.memory_space<vmem>>, vector<32x16xf32>
    %cst_69 = arith.constant dense<0.000000e+00> : vector<16x16xf32>
    %176 = tpu.matmul %174, %175, %cst_69 {dimension_numbers = #tpu.dot_dimension_numbers<[1], [0], [0], [1], [0, 0, 1, 1], [], []>} : vector<16x32xf32>, vector<32x16xf32>, vector<16x16xf32> -> vector<16x16xf32>
    %c600 = arith.constant 600 : index
    %c0_70 = arith.constant 0 : index
    %177 = vector.load %arg2[%c600, %c0_70] : memref<688x128xf32, #tpu.memory_space<vmem>>, vector<1x16xf32>
    %178 = vector.broadcast %177 : vector<1x16xf32> to vector<16x16xf32>
    %179 = arith.addf %176, %178 : vector<16x16xf32>
    %cst_71 = arith.constant 5.000000e-01 : f32
    %180 = vector.broadcast %cst_71 : f32 to vector<16x16xf32>
    %181 = arith.mulf %180, %179 : vector<16x16xf32>
    %cst_72 = arith.constant 0.707106769 : f32
    %182 = vector.broadcast %cst_72 : f32 to vector<16x16xf32>
    %183 = arith.mulf %179, %182 : vector<16x16xf32>
    %184 = math.erf %183 : vector<16x16xf32>
    %cst_73 = arith.constant 1.000000e+00 : f32
    %185 = vector.broadcast %cst_73 : f32 to vector<16x16xf32>
    %186 = arith.addf %185, %184 : vector<16x16xf32>
    %187 = arith.mulf %181, %186 : vector<16x16xf32>
    %c608 = arith.constant 608 : index
    %c0_74 = arith.constant 0 : index
    %188 = vector.load %arg2[%c608, %c0_74] : memref<688x128xf32, #tpu.memory_space<vmem>>, vector<16x32xf32>
    %cst_75 = arith.constant dense<0.000000e+00> : vector<16x32xf32>
    %189 = tpu.matmul %187, %188, %cst_75 {dimension_numbers = #tpu.dot_dimension_numbers<[1], [0], [0], [1], [0, 0, 1, 1], [], []>} : vector<16x16xf32>, vector<16x32xf32>, vector<16x32xf32> -> vector<16x32xf32>
    %190 = arith.addf %150, %189 : vector<16x32xf32>
    %c624 = arith.constant 624 : index
    %c0_76 = arith.constant 0 : index
    %191 = vector.load %arg2[%c624, %c0_76] : memref<688x128xf32, #tpu.memory_space<vmem>>, vector<1x32xf32>
    %192 = vector.broadcast %191 : vector<1x32xf32> to vector<16x32xf32>
    %193 = arith.addf %190, %192 : vector<16x32xf32>
    %c632 = arith.constant 632 : index
    %c0_77 = arith.constant 0 : index
    %194 = vector.load %arg2[%c632, %c0_77] : memref<688x128xf32, #tpu.memory_space<vmem>>, vector<1x32xf32>
    %c640 = arith.constant 640 : index
    %c0_78 = arith.constant 0 : index
    %195 = vector.load %arg2[%c640, %c0_78] : memref<688x128xf32, #tpu.memory_space<vmem>>, vector<1x32xf32>
    %cst_79 = arith.constant dense<0.000000e+00> : vector<16xf32>
    %196 = vector.multi_reduction <add>, %193, %cst_79 [1] : vector<16x32xf32> to vector<16xf32>
    %197 = vector.shape_cast %196 : vector<16xf32> to vector<16x1xf32>
    %cst_80 = arith.constant 3.200000e+01 : f32
    %198 = vector.broadcast %cst_80 : f32 to vector<16x1xf32>
    %199 = arith.divf %197, %198 : vector<16x1xf32>
    %200 = vector.broadcast %199 : vector<16x1xf32> to vector<16x32xf32>
    %201 = arith.subf %193, %200 : vector<16x32xf32>
    %202 = arith.mulf %201, %201 : vector<16x32xf32>
    %cst_81 = arith.constant dense<0.000000e+00> : vector<16xf32>
    %203 = vector.multi_reduction <add>, %202, %cst_81 [1] : vector<16x32xf32> to vector<16xf32>
    %204 = vector.shape_cast %203 : vector<16xf32> to vector<16x1xf32>
    %cst_82 = arith.constant 3.200000e+01 : f32
    %205 = vector.broadcast %cst_82 : f32 to vector<16x1xf32>
    %206 = arith.divf %204, %205 : vector<16x1xf32>
    %207 = vector.broadcast %199 : vector<16x1xf32> to vector<16x32xf32>
    %208 = arith.subf %193, %207 : vector<16x32xf32>
    %cst_83 = arith.constant 9.99999974E-6 : f32
    %209 = vector.broadcast %cst_83 : f32 to vector<16x1xf32>
    %210 = arith.addf %206, %209 : vector<16x1xf32>
    %211 = math.rsqrt %210 : vector<16x1xf32>
    %212 = vector.broadcast %211 : vector<16x1xf32> to vector<16x32xf32>
    %213 = arith.mulf %208, %212 : vector<16x32xf32>
    %214 = vector.broadcast %194 : vector<1x32xf32> to vector<16x32xf32>
    %215 = arith.mulf %213, %214 : vector<16x32xf32>
    %216 = vector.broadcast %195 : vector<1x32xf32> to vector<16x32xf32>
    %217 = arith.addf %215, %216 : vector<16x32xf32>
    %cst_84 = arith.constant dense<0.000000e+00> : vector<32xf32>
    %218 = vector.multi_reduction <add>, %217, %cst_84 [0] : vector<16x32xf32> to vector<32xf32>
    %219 = vector.shape_cast %218 : vector<32xf32> to vector<1x32xf32>
    %cst_85 = arith.constant 1.600000e+01 : f32
    %220 = vector.broadcast %cst_85 : f32 to vector<1x32xf32>
    %221 = arith.divf %219, %220 : vector<1x32xf32>
    %c648 = arith.constant 648 : index
    %c0_86 = arith.constant 0 : index
    %222 = vector.load %arg2[%c648, %c0_86] : memref<688x128xf32, #tpu.memory_space<vmem>>, vector<32x128xf32>
    %cst_87 = arith.constant dense<0.000000e+00> : vector<1x128xf32>
    %223 = tpu.matmul %221, %222, %cst_87 {dimension_numbers = #tpu.dot_dimension_numbers<[1], [0], [0], [1], [0, 0, 1, 1], [], []>} : vector<1x32xf32>, vector<32x128xf32>, vector<1x128xf32> -> vector<1x128xf32>
    %c680 = arith.constant 680 : index
    %c0_88 = arith.constant 0 : index
    %224 = vector.load %arg2[%c680, %c0_88] : memref<688x128xf32, #tpu.memory_space<vmem>>, vector<1x128xf32>
    %225 = arith.addf %223, %224 : vector<1x128xf32>
    %c0_89 = arith.constant 0 : index
    %c0_90 = arith.constant 0 : index
    %c0_91 = arith.constant 0 : index
    %226 = vector.load %arg3[%c0_89, %c0_90, %c0_91] : memref<1x1x128xf32, #tpu.memory_space<vmem>>, vector<1x1x128xf32>
    %227 = vector.shape_cast %226 : vector<1x1x128xf32> to vector<1x128xf32>
    %228 = vector.shape_cast %225 : vector<1x128xf32> to vector<1x1x128xf32>
    tpu.vector_store %arg3[%c0_89, %c0_90, %c0_91], %228 {strides = array<i32>} : memref<1x1x128xf32, #tpu.memory_space<vmem>>, vector<1x1x128xf32>,
    return
  }
  func.func @transform_0(%arg0: i32) -> (i32, i32, i32) {
    %c0_i32 = arith.constant 0 : i32
    %c0_i32_0 = arith.constant 0 : i32
    %c0_i32_1 = arith.constant 0 : i32
    return %arg0, %c0_i32, %c0_i32_0 : i32, i32, i32
  }
  func.func @transform_1(%arg0: i32) -> (i32, i32) {
    %c0_i32 = arith.constant 0 : i32
    %c0_i32_0 = arith.constant 0 : i32
    %c0_i32_1 = arith.constant 0 : i32
    return %c0_i32, %c0_i32_0 : i32, i32
  }
  func.func @transform_2(%arg0: i32) -> (i32, i32, i32) {
    %c0_i32 = arith.constant 0 : i32
    %c0_i32_0 = arith.constant 0 : i32
    %c0_i32_1 = arith.constant 0 : i32
    return %arg0, %c0_i32, %c0_i32_0 : i32, i32, i32
  }
}

</mosaic_0001>

<bundles_post_ra>
// kernel: tpu_custom_call.1
= control target key start
LH: loop header
LB: loop body
LE: loop exit
PB: predicated region body
PF: predicated region fallthrough
CT: control target
= control target key end

     0   :  { %7 = vsyncpa [#allocation3], 0  ;;  %s2719_s0 = inlined_call_operand.vmem [shape: f32[2,57,1], index: 0, kind: input, shape index: {}]   ;;  %s2720_s1 = inlined_call_operand.hbm [shape: f32[688,128], index: 1, kind: input, shape index: {}]   ;;  %s2721_s2 = inlined_call_operand.hbm [shape: f32[2,1,128], index: 2, kind: output, shape index: {}]  }
   0x1   :  { %8 = vsyncpa [#allocation4], 0 }
   0x2   :  { %10 = vsyncpa [#allocation4 + $0x1], 0  ;;  %s2507_s9 = smov 0   ;;  %s2509_s10 = smov 0  }
   0x3   :  { %s2511_s11 = smov 0   ;;  %s2513_s12 = smov 0  }
   0x4 LB: > { %s2528_s13 = sadd.s32 4294967295, %s2483_s12   ;;  %s1960_s14 = sadd.s32 4294967294, %s2483_s12   ;;  %s2483_s12 = sphi %s2513_s12, %s2729_s12   ;;  %s2479_s11 = sphi %s2511_s11, %s2728_s11   ;;  %s2475_s10 = sphi %s2509_s10, %s2727_s10   ;;  %s2471_s9 = sphi %s2507_s9, %s2726_s9  }
   0x5   : > { %s2532_s15 = sadd.s32 1, %s2483_s12   ;;  %s70_s16 = sadd.s32 1, %s2479_s11 }
   0x6   : > { %s67_s17 = ssub.s32 %s2483_s12, %s2532_s15  ;;  %p80_p0 = scmp.ne.s32.totalorder %s2479_s11, %s2475_s10 }
   0x7   : > { %p68_p1 = scmp.eq.s32.totalorder %s67_s17, 0  ;;  %p81_p2 = scmp.eq.s32.totalorder %s2528_s13, 1 }
   0x8   : > { %p86_p3 = scmp.ne.s32.totalorder %s2475_s10, %s2471_s9  ;;  %p87_p4 = scmp.eq.s32.totalorder %s1960_s14, 1 }
   0x9   : > { %s2543_s18 = scalar_select %p68_p1, %s2479_s11, %s70_s16  }
   0xa   : > { %p2545_p5 = por %p81_p2, %p80_p0  ;;  %p2549_p6 = por %p87_p4, %p86_p3 }
   0xb   : > { %p1961_p7 = scmp.ge.s32.totalorder %s2483_s12, 1  ;;  %p94_p8 = scmp.lt.s32.totalorder %s2483_s12, 3 }
   0xc   : > { %s2723_s20 = scalar_select %p2549_p6, 1, 0 }
   0xd   : > { %p2290_p9 = scmp.eq.s32.totalorder %s2528_s13, 0  ;;  %p2556_p10 = pnand %p1961_p7, %p94_p8 }
   0xe   : > { %s2485_s22 = smov [#allocation2]  }
   0xf   : > { %s106_s23 = sshll.u32 %s2485_s22, 4  ;;  %p2282_p11 = pneg %p2556_p10  ;;  %s107_s23 = int_to_ptr.vmem [resolvable:$true] %s106_s23 }
  0x10   : > { %s2404_s24 = scalar_lea.vmem %s107_s23, 11008  ;;  %p2412_p3 = scmp.lt.s32.totalorder %s107_s23, %s107_s23 }
  0x11   : > { %p2283_p12 = pnand %p2290_p9, %p2282_p11  ;;  %p2405_p0 = scmp.ne.s32.totalorder %s107_s23, %s2404_s24 }
  0x12   : > { %p2413_p4 = scmp.lt.s32.totalorder %s2404_s24, %s2404_s24 }
  0x13   : > { %p2395_p13 = pneg %p2283_p12 }
  0x14   : > { %p2414_p6 = por %p2413_p4, %p2412_p3 }
  0x15   : > { %p2407_p1 = pnand %p2405_p0, %p2395_p13 }
  0x17   : > { %p2408_p2 = pneg %p2407_p1 }
  0x19   : > { %p2415_p7 = pnand %p2414_p6, %p2408_p2 }
  0x1b   : > { %2418 = shalt.err (!%p2415_p7)
}
  0x1c   : > { %s2486_s25 = smov 128   ;;  %s2487_s26 = smov 8  }
  0x1d   : > { %2285 = dma.hbm_to_vmem [thread:$0]  (!%p2283_p12), %s2720_s1, 11008, %s107_s23, [#allocation3], %s2486_s25, %s2486_s25, %s2487_s26  }
  0x1e   : > { %130 = sbr.rel (%p2556_p10) target bundleno = 4280 (0x10b8), region = 28 }
  0x23   : > { %2462 = dma.done.wait (%p2290_p9), [#allocation3], 11008  }
  0x24   : > { %2464 = vsyncadd (%p2290_p9), [#allocation3], 4294956288  ;;  %p151_p8 = scmp.lt.s32.totalorder %s2528_s13, 1  ;;  %v2488_v0 = vmov 0   ;;  %vm181_vm0 = vcmask 1040384   ;;  %vm168_vm1 = vcmask 465920  }
  0x25   : > { %2331 = vset.pattern.permute.xlu0 %v2488_v0  ;;  %2332 = vset.pattern.permute.xlu1 %v2488_v0  ;;  %v156_v4 = vld [vmem:[#allocation2] sm:$0xff]  ;;  %v157_v10 = vld [vmem:[#allocation2 + $0x8] sm:$0xff]  ;;  %v158_v11 = vld [vmem:[#allocation2 + $0x10] sm:$0xff]  ;;  %vm286_vm2 = vcmask 130048   ;;  %vm557_vm3 = vcmask 261120   ;;  %vm824_vm4 = vcmask 523264  }
  0x26   : > { %s152_s29 = scalar_select %p151_p8, %s2528_s13, 1  ;;  %2132 = vmatprep.mubr.msk.f32.mxu0 %vm168_vm1, %v156_v4  ;;  %v159_v12 = vld [vmem:[#allocation2 + $0x18] sm:$0xff]  ;;  %v270_v15 = vld [vmem:[#allocation2 + $0x20] sm:$0xff]  ;;  %v272_v21 = vld [vmem:[#allocation2 + $0x30] sm:$0xff]  ;;  %vm2490_vm5 = vmmov 0  }
  0x27   : > { %2142 = vmatprep.mubr.msk.f32.mxu1 %vm286_vm2, %v270_v15  ;;  %v273_v18 = vld [vmem:[#allocation2 + $0x38] sm:$0xff]  ;;  %v370_v26 = vld [vmem:[#allocation2 + $0x50] sm:$0xff]  ;;  %v271_v27 = vld [vmem:[#allocation2 + $0x28] sm:$0xff]  ;;  %s149_s6 = sand.u32 1, %s2475_s10   ;;  %s2023_s7 = sshll.u32 %s2528_s13, 4 }
  0x28   : > { %s2026_s30 = sshll.u32 %s152_s29, 6  ;;  %v371_v23 = vld [vmem:[#allocation2 + $0x58] sm:$0xff]  ;;  %v368_v29 = vld [vmem:[#allocation2 + $0x40] sm:$0xff]  ;;  %v369_v32 = vld [vmem:[#allocation2 + $0x48] sm:$0xff]  ;;  %s150_s8 = scalar_lea.vmem [#allocation5], %s149_s6 }
  0x29   : > { %s155_s5 = scalar_lea.vmem %s2719_s0, %s2026_s30  ;;  %v468_v33 = vld [vmem:[#allocation2 + $0x68] sm:$0xff]  ;;  %v467_v34 = vld [vmem:[#allocation2 + $0x60] sm:$0xff]  ;;  %v1977_v41 = vld [vmem:[#allocation2 + $0x70] ss:$0 sm:$0xff]  ;;  %s1893_s14 = sshll.u32 %s150_s8, 4  ;;  %s1894_s14 = int_to_ptr.vmem [resolvable:$true] %s1893_s14 }
  0x2a   : > { %v167_v1 = vld [vmem:[%s155_s5 + $0x38] sm:$0x1]  ;;  %v166_v2 = vld [vmem:[%s155_s5 + $0x30] sm:$0xff]  ;;  %v165_v3 = vld [vmem:[%s155_s5 + $0x28] sm:$0xff]  ;;  %s2684_s21 = scalar_lea.hbm %s2721_s2, %s2023_s7  ;;  %s1881_s22 = scalar_lea.sflag [#allocation4], %s149_s6 }
  0x2b   : > { %2116 = vmatprep.subr.msk.mxu0 %vm181_vm0, %v167_v1  ;;  %v164_v5 = vld [vmem:[%s155_s5 + $0x20] sm:$0xff]  ;;  %v163_v6 = vld [vmem:[%s155_s5 + $0x18] sm:$0xff]  ;;  %v162_v7 = vld [vmem:[%s155_s5 + $0x10] sm:$0xff]  ;;  %s2419_s23 = scalar_lea.vmem %s1894_s14, 16  ;;  %s2491_s24 = smov [#allocation5]  }
  0x2c   : > { %2117 = vmatpush3.msk.msra.mxu0 %vm181_vm0, %v167_v1  ;;  %v161_v8 = vld [vmem:[%s155_s5 + $0x8] sm:$0xff]  ;;  %v160_v9 = vld [vmem:[%s155_s5] sm:$0xff]  ;;  %v610_v49 = vld [vmem:[#allocation2 + $0xf0] sm:$0xff]  ;;  %p2420_p6 = scmp.ne.s32.totalorder %s1894_s14, %s2419_s23  ;;  %s2423_s13 = sshll.u32 %s2491_s24, 4  ;;  %s2424_s13 = int_to_ptr.vmem [resolvable:$false] %s2423_s13 }
  0x2d   : > { %2118 = vmatprep.subr.mxu0 %v166_v2  ;;  %v612_v48 = vld [vmem:[#allocation2 + $0x100] sm:$0xff]  ;;  %v609_v50 = vld [vmem:[#allocation2 + $0xe8] sm:$0xff]  ;;  %v607_v51 = vld [vmem:[#allocation2 + $0xd8] sm:$0xff]  ;;  %s2425_s25 = scalar_lea.vmem %s2424_s13, 32  ;;  %p2426_p11 = scmp.lt.s32.totalorder %s1894_s14, %s2424_s13 }
  0x2e   : > { %2119 = vmatpush3.msra.mxu0 %v166_v2  ;;  %v605_v52 = vld [vmem:[#allocation2 + $0xc8] sm:$0xff]  ;;  %v909_v53 = vld [vmem:[#allocation2 + $0x120] sm:$0xff]  ;;  %v611_v0 = vld [vmem:[#allocation2 + $0xf8] sm:$0xff]  ;;  %p2421_p9 = pnand %p2420_p6, %p2545_p5  ;;  %p2427_p12 = scmp.lt.s32.totalorder %s2425_s25, %s2419_s23 }
  0x2f   : > { %2120 = vmatprep.subr.mxu0 %v165_v3  ;;  %v608_v1 = vld [vmem:[#allocation2 + $0xe0] sm:$0xff]  ;;  %v606_v2 = vld [vmem:[#allocation2 + $0xd0] sm:$0xff]  ;;  %v597_v4 = vld [vmem:[#allocation2 + $0x88] sm:$0xff] }
  0x30   : > { %2121 = vmatpush3.msra.mxu0 %v165_v3  ;;  %v908_v3 = vld [vmem:[#allocation2 + $0x118] sm:$0xff]  ;;  %p2422_p10 = pneg %p2421_p9  ;;  %p2428_p13 = por %p2427_p12, %p2426_p11 }
  0x31   : > { %2122 = vmatprep.subr.mxu0 %v164_v5 }
  0x32   : > { %2123 = vmatpush3.msra.mxu0 %v164_v5  ;;  %p2429_p0 = pnand %p2428_p13, %p2422_p10 }
  0x33   : > { %2124 = vmatprep.subr.mxu0 %v163_v6 }
  0x34   : > { %2125 = vmatpush3.msra.mxu0 %v163_v6 }
  0x35   : > { %2126 = vmatprep.subr.mxu0 %v162_v7 }
  0x36   : > { %2127 = vmatpush3.msra.mxu0 %v162_v7 }
  0x37   : > { %2128 = vmatprep.subr.mxu0 %v161_v8 }
  0x38   : > { %2129 = vmatpush3.msra.mxu0 %v161_v8 }
  0x39   : > { %2130 = vmatprep.subr.mxu0 %v160_v9 }
  0x3a   : > { %2131 = vmatpush3.msra.mxu0 %v160_v9 }
  0x3b   : > { %2133 = vmatmul.mubr.msk.f32.vlgmr.msra.gmra.mxu0 %vm168_vm1, %v157_v10 }
  0x3c   : > { %2135 = vmatprep.mubr.msk.f32.mxu0 %vm168_vm1, %v158_v11 }
  0x3f   : > { %2136 = vmatmul.mubr.msk.f32.gmra.mxu0 %vm168_vm1, %v159_v12  ;;  %v1980_v12 = vld [vmem:[#allocation2 + $0x78] ss:$0 sm:$0xff] }
  0xfb   : > { %v2134_v13 = vpop.f32.mrf.mxu0 }
  0xfc   : > { %281 = vperm.xlu0 %2331, %v2134_v13  }
  0xfd   : > { %v251_v14 = vpop.f32.mrf.mxu0 }
  0xff   : > { %v2137_v16 = vpop.f32.mrf.mxu0 }
 0x100   : > { %276 = vperm.xlu0 %2331, %v251_v14   ;;  %379 = vperm.xlu1 %2332, %v2137_v16   ;;  %v1981_v14 = vld [vmem:[#allocation2 + $0x80] ss:$0 sm:$0xff] }
 0x101   : > { %v261_v17 = vpop.f32.mrf.mxu0 }
 0x104   : > { %374 = vperm.xlu1 %2332, %v261_v17  }
 0x177   : > { %v282_v19 = vpop.permute.xlu0 %281 }
 0x178   : > { %v285_v20 = vmul.f32 %v282_v19, %v273_v18 }
 0x17a   : > { %2138 = vmatprep.subr.mxu1 %v285_v20 }
 0x17b   : > { %2139 = vmatpush3.msra.mxu1 %v285_v20  ;;  %v277_v22 = vpop.permute.xlu0 %276  ;;  %v380_v24 = vpop.permute.xlu1 %379 }
 0x17c   : > { %v284_v25 = vmul.f32 %v277_v22, %v272_v21  ;;  %v383_v28 = vmul.f32 %v380_v24, %v371_v23  ;;  %v598_v21 = vld [vmem:[#allocation2 + $0x90] sm:$0xff]  ;;  %v599_v22 = vld [vmem:[#allocation2 + $0x98] sm:$0xff]  ;;  %v600_v23 = vld [vmem:[#allocation2 + $0xa0] sm:$0xff] }
 0x17d   : > { %v601_v24 = vld [vmem:[#allocation2 + $0xa8] sm:$0xff] }
 0x17e   : > { %2140 = vmatprep.subr.mxu1 %v284_v25 }
 0x17f   : > { %2141 = vmatpush3.msra.mxu1 %v284_v25  ;;  %v375_v30 = vpop.permute.xlu1 %374  ;;  %v602_v25 = vld [vmem:[#allocation2 + $0xb0] sm:$0xff] }
 0x180   : > { %v382_v31 = vmul.f32 %v375_v30, %v370_v26  ;;  %2143 = vmatmul.mubr.msk.f32.vlgmr.msra.gmra.mxu1 %vm286_vm2, %v271_v27  ;;  %2145 = vmatprep.subr.mxu1 %v383_v28  ;;  %v603_v26 = vld [vmem:[#allocation2 + $0xb8] sm:$0xff]  ;;  %v604_v27 = vld [vmem:[#allocation2 + $0xc0] sm:$0xff] }
 0x181   : > { %2146 = vmatpush3.msra.mxu1 %v383_v28  ;;  %2149 = vmatprep.mubr.msk.f32.mxu1 %vm286_vm2, %v368_v29  ;;  %v822_v28 = vld [vmem:[#allocation2 + $0x108] sm:$0xff] }
 0x182   : > { %2147 = vmatprep.subr.mxu1 %v382_v31  ;;  %2191 = vmatprep.mubr.msk.f32.mxu0 %vm824_vm4, %v822_v28 }
 0x183   : > { %2148 = vmatpush3.msra.mxu1 %v382_v31 }
 0x184   : > { %2150 = vmatmul.mubr.msk.f32.vlgmr.msra.gmra.mxu1 %vm286_vm2, %v369_v32  ;;  %2152 = vmatprep.subr.mxu1 %v468_v33 }
 0x185   : > { %2153 = vmatpush3.msra.mxu1 %v468_v33 }
 0x186   : > { %2154 = vmatprep.subr.mxu1 %v467_v34 }
 0x187   : > { %2155 = vmatpush3.msra.mxu1 %v467_v34 }
 0x240   : > { %v2144_v35 = vpop.f32.mrf.mxu1 }
 0x242   : > { %v359_v36 = vpop.f32.mrf.mxu1 }
 0x244   : > { %v2151_v37 = vpop.f32.mrf.mxu1 }
 0x245   : > { %v466_v40 = vmul.f32 %v2151_v37, %v2144_v35 }
 0x246   : > { %v456_v38 = vpop.f32.mrf.mxu1 }
 0x247   : > { %v465_v39 = vmul.f32 %v456_v38, %v359_v36 }
 0x249   : > { %2156 = vmatprep.mubr.msk.f32.mxu1 %vm286_vm2, %v465_v39 }
 0x24a   : > { %2157 = vmatmul.mubr.msk.f32.vlgmr.msra.gmra.mxu1 %vm286_vm2, %v466_v40 }
 0x24b   : > { %2163 = vmatprep.mubr.msk.f32.mxu1 %vm286_vm2, %v597_v4 }
 0x30a   : > { %v2158_v42 = vpop.f32.mrf.mxu1 }
 0x30b   : > { %v2588_v43 = vadd.f32 %v2158_v42, %v1977_v41 }
 0x30c   : > { %v546_v44 = vpop.f32.mrf.mxu1 }
 0x30d   : > { %v2590_v45 = vadd.f32 %v1977_v41, %v546_v44  ;;  %v561_v46 = vsel %vm557_vm3, %v2588_v43, 0.0 }
 0x30e   : > { %562 = vadd.xlane.f32.xlu0 %v561_v46 }
 0x30f   : > { %v558_v47 = vsel %vm557_vm3, %v2590_v45, 0.0 }
 0x310   : > { %559 = vadd.xlane.f32.xlu1 %v558_v47 }
 0x321   : > { %650 = vperm.xlu1 %2332, %v612_v48  }
 0x325   : > { %640 = vperm.xlu1 %2332, %v610_v49  }
 0x329   : > { %635 = vperm.xlu1 %2332, %v609_v50  }
 0x32d   : > { %625 = vperm.xlu1 %2332, %v607_v51  }
 0x331   : > { %615 = vperm.xlu1 %2332, %v605_v52  }
 0x335   : > { %917 = vperm.xlu1 %2332, %v909_v53  }
 0x397   : > { %v563_v54 = vpop.xlane.xlu0 %562 }
 0x398   : > { %v566_v55 = vmul.f32 0.03125, %v563_v54 }
 0x399   : > { %v560_v56 = vpop.xlane.xlu1 %559 }
 0x39a   : > { %v568_v57 = vsub.f32 %v2588_v43, %v566_v55  ;;  %v565_v58 = vmul.f32 0.03125, %v560_v56 }
 0x39c   : > { %v567_v59 = vsub.f32 %v2590_v45, %v565_v58  ;;  %v570_v60 = vmul.f32 %v568_v57, %v568_v57 }
 0x39d   : > { %v651_v29 = vpop.permute.xlu1 %650 }
 0x39e   : > { %v574_v61 = vsel %vm557_vm3, %v570_v60, 0.0  ;;  %v569_v62 = vmul.f32 %v567_v59, %v567_v59 }
 0x39f   : > { %575 = vadd.xlane.f32.xlu0 %v574_v61 }
 0x3a0   : > { %v571_v63 = vsel %vm557_vm3, %v569_v62, 0.0 }
 0x3a1   : > { %v641_v30 = vpop.permute.xlu1 %640 }
 0x3a3   : > { %572 = vadd.xlane.f32.xlu0 %v571_v63 }
 0x3a5   : > { %v636_v35 = vpop.permute.xlu1 %635 }
 0x3a9   : > { %v626_v42 = vpop.permute.xlu1 %625 }
 0x3ad   : > { %v616_v58 = vpop.permute.xlu1 %615 }
 0x3b9   : > { %645 = vperm.xlu0 %2331, %v611_v0  }
 0x3bd   : > { %630 = vperm.xlu0 %2331, %v608_v1  }
 0x3c1   : > { %620 = vperm.xlu0 %2331, %v606_v2  }
 0x3c5   : > { %912 = vperm.xlu0 %2331, %v908_v3  }
 0x428   : > { %v576_v5 = vpop.xlane.xlu0 %575 }
 0x429   : > { %v578_v6 = vmul.f32 0.03125, %v576_v5 }
 0x42b   : > { %v580_v7 = vadd.f32 1e-05, %v578_v6 }
 0x42c   : > { %v573_v8 = vpop.xlane.xlu0 %572 }
 0x42d   : > { %2333 = vrsqrt.f32 %v580_v7  ;;  %v577_v9 = vmul.f32 0.03125, %v573_v8 }
 0x42f   : > { %v579_v10 = vadd.f32 1e-05, %v577_v9 }
 0x431   : > { %2335 = vrsqrt.f32 %v579_v10 }
 0x434   : > { %v646_v33 = vpop.permute.xlu0 %645 }
 0x438   : > { %v631_v39 = vpop.permute.xlu0 %630 }
 0x43a   : > { %v2334_v11 = vpop.eup %2333 }
 0x43b   : > { %v584_v13 = vmul.f32 %v2334_v11, %v568_v57 }
 0x43c   : > { %v621_v54 = vpop.permute.xlu0 %620 }
 0x43d   : > { %v590_v15 = vmul.f32 %v1980_v12, %v584_v13 }
 0x43e   : > { %v2336_v16 = vpop.eup %2335 }
 0x43f   : > { %v596_v17 = vadd.f32 %v1981_v14, %v590_v15  ;;  %v583_v18 = vmul.f32 %v2336_v16, %v567_v59 }
 0x441   : > { %2159 = vmatprep.subr.mxu1 %v596_v17  ;;  %v589_v19 = vmul.f32 %v1980_v12, %v583_v18 }
 0x442   : > { %2160 = vmatpush3.msra.mxu1 %v596_v17 }
 0x443   : > { %v595_v20 = vadd.f32 %v1981_v14, %v589_v19 }
 0x445   : > { %2161 = vmatprep.subr.mxu1 %v595_v20 }
 0x446   : > { %2162 = vmatpush3.msra.mxu1 %v595_v20 }
 0x447   : > { %2164 = vmatmul.mubr.msk.f32.vlgmr.msra.gmra.mxu1 %vm286_vm2, %v598_v21 }
 0x448   : > { %2166 = vmatprep.mubr.msk.f32.mxu1 %vm286_vm2, %v599_v22 }
 0x44b   : > { %2167 = vmatmul.mubr.msk.f32.gmra.mxu1 %vm286_vm2, %v600_v23 }
 0x44c   : > { %2169 = vmatprep.mubr.msk.f32.mxu1 %vm286_vm2, %v601_v24 }
 0x44f   : > { %2170 = vmatmul.mubr.msk.f32.gmra.mxu1 %vm286_vm2, %v602_v25 }
 0x450   : > { %2172 = vmatprep.mubr.msk.f32.mxu1 %vm286_vm2, %v603_v26 }
 0x453   : > { %2173 = vmatmul.mubr.msk.f32.gmra.mxu1 %vm286_vm2, %v604_v27 }
 0x507   : > { %v2165_v31 = vpop.f32.mrf.mxu1 }
 0x508   : > { %v749_v55 = vadd.f32 %v2165_v31, %v621_v54  ;;  %v823_v31 = vld [vmem:[#allocation2 + $0x110] sm:$0xff]  ;;  %v963_v54 = vld [vmem:[#allocation2 + $0x140] sm:$0xff] }
 0x509   : > { %v743_v32 = vpop.f32.mrf.mxu1 }
 0x50a   : > { %v744_v59 = vadd.f32 %v743_v32, %v616_v58  ;;  %v791_v61 = vmul.f32 0.70710677, %v749_v55  ;;  %v783_v25 = vmul.f32 0.5, %v749_v55  ;;  %v962_v55 = vld [vmem:[#allocation2 + $0x138] sm:$0xff] }
 0x50b   : > { %v2168_v34 = vpop.f32.mrf.mxu1 }
 0x50c   : > { %v759_v47 = vadd.f32 %v2168_v34, %v631_v39  ;;  %v790_v62 = vmul.f32 0.70710677, %v744_v59  ;;  %v782_v28 = vmul.f32 0.5, %v744_v59  ;;  %v918_v34 = vpop.permute.xlu1 %917 }
 0x50d   : > { %v753_v36 = vpop.f32.mrf.mxu1 }
 0x50e   : > { %v754_v51 = vadd.f32 %v753_v36, %v626_v42  ;;  %v793_v56 = vmul.f32 0.70710677, %v759_v47  ;;  %v785_v18 = vmul.f32 0.5, %v759_v47 }
 0x50f   : > { %v2171_v37 = vpop.f32.mrf.mxu1 }
 0x510   : > { %v769_v38 = vadd.f32 %v2171_v37, %v641_v30  ;;  %v792_v60 = vmul.f32 0.70710677, %v754_v51  ;;  %v784_v22 = vmul.f32 0.5, %v754_v51 }
 0x511   : > { %v763_v40 = vpop.f32.mrf.mxu1 }
 0x512   : > { %v764_v41 = vadd.f32 %v763_v40, %v636_v35  ;;  %v795_v44 = vmul.f32 0.70710677, %v769_v38  ;;  %v787_v10 = vmul.f32 0.5, %v769_v38  ;;  %v913_v38 = vpop.permute.xlu0 %912 }
 0x513   : > { %v2174_v46 = vpop.f32.mrf.mxu1 }
 0x514   : > { %v779_v48 = vadd.f32 %v2174_v46, %v651_v29  ;;  %v794_v49 = vmul.f32 0.70710677, %v764_v41  ;;  %2337 = verf.f32 %v795_v44  ;;  %v786_v14 = vmul.f32 0.5, %v764_v41 }
 0x515   : > { %v773_v50 = vpop.f32.mrf.mxu1 }
 0x516   : > { %v797_v52 = vmul.f32 0.70710677, %v779_v48  ;;  %v774_v53 = vadd.f32 %v773_v50, %v646_v33  ;;  %v789_v2 = vmul.f32 0.5, %v779_v48 }
 0x518   : > { %2339 = verf.f32 %v797_v52  ;;  %v796_v57 = vmul.f32 0.70710677, %v774_v53  ;;  %v788_v5 = vmul.f32 0.5, %v774_v53  ;;  %v965_v52 = vld [vmem:[#allocation2 + $0x150] sm:$0xff]  ;;  %v964_v53 = vld [vmem:[#allocation2 + $0x148] sm:$0xff] }
 0x519   : > { %2341 = verf.f32 %v794_v49  ;;  %2194 = vmatprep.subr.mxu1 %v965_v52 }
 0x51a   : > { %2343 = verf.f32 %v796_v57  ;;  %2195 = vmatpush3.msra.mxu1 %v965_v52  ;;  %v1504_v52 = vld [vmem:[#allocation2 + $0x218] sm:$0xff] }
 0x51b   : > { %2345 = verf.f32 %v793_v56  ;;  %2196 = vmatprep.subr.mxu1 %v964_v53 }
 0x51c   : > { %2347 = verf.f32 %v792_v60  ;;  %2197 = vmatpush3.msra.mxu1 %v964_v53  ;;  %v1505_v53 = vld [vmem:[#allocation2 + $0x220] sm:$0xff] }
 0x51d   : > { %2349 = verf.f32 %v791_v61  ;;  %2198 = vmatprep.subr.mxu1 %v963_v54 }
 0x51e   : > { %2351 = verf.f32 %v790_v62  ;;  %2199 = vmatpush3.msra.mxu1 %v963_v54  ;;  %v1194_v54 = vld [vmem:[#allocation2 + $0x188] sm:$0xff] }
 0x51f   : > { %2200 = vmatprep.subr.mxu1 %v962_v55 }
 0x520   : > { %2201 = vmatpush3.msra.mxu1 %v962_v55 }
 0x521   : > { %v2338_v63 = vpop.eup %2337 }
 0x522   : > { %v811_v8 = vadd.f32 1.0, %v2338_v63  ;;  %v1992_v63 = vld [vmem:[#allocation2 + $0x128] ss:$0 sm:$0xff] }
 0x524   : > { %v819_v15 = vmul.f32 %v811_v8, %v787_v10  ;;  %v1063_v8 = vld [vmem:[#allocation2 + $0x168] sm:$0xff]  ;;  %v1994_v10 = vld [vmem:[#allocation2 + $0x158] ss:$0 sm:$0xff] }
 0x525   : > { %v2340_v0 = vpop.eup %2339 }
 0x526   : > { %v2342_v1 = vpop.eup %2341  ;;  %v813_v3 = vadd.f32 1.0, %v2340_v0 }
 0x527   : > { %v2344_v4 = vpop.eup %2343  ;;  %v810_v12 = vadd.f32 1.0, %v2342_v1  ;;  %v1993_v1 = vld [vmem:[#allocation2 + $0x130] ss:$0 sm:$0xff] }
 0x528   : > { %v821_v6 = vmul.f32 %v813_v3, %v789_v2  ;;  %v812_v7 = vadd.f32 1.0, %v2344_v4  ;;  %v2346_v9 = vpop.eup %2345 }
 0x529   : > { %v2348_v13 = vpop.eup %2347  ;;  %v809_v16 = vadd.f32 1.0, %v2346_v9  ;;  %v818_v19 = vmul.f32 %v810_v12, %v786_v14  ;;  %v1062_v9 = vld [vmem:[#allocation2 + $0x160] sm:$0xff] }
 0x52a   : > { %2175 = vmatprep.subr.mxu0 %v821_v6  ;;  %v820_v11 = vmul.f32 %v812_v7, %v788_v5  ;;  %v2350_v17 = vpop.eup %2349  ;;  %v808_v20 = vadd.f32 1.0, %v2348_v13 }
 0x52b   : > { %2176 = vmatpush3.msra.mxu0 %v821_v6  ;;  %v2352_v21 = vpop.eup %2351  ;;  %v817_v23 = vmul.f32 %v809_v16, %v785_v18  ;;  %v807_v24 = vadd.f32 1.0, %v2350_v17 }
 0x52c   : > { %2177 = vmatprep.subr.mxu0 %v820_v11  ;;  %v816_v26 = vmul.f32 %v808_v20, %v784_v22  ;;  %v806_v27 = vadd.f32 1.0, %v2352_v21 }
 0x52d   : > { %2178 = vmatpush3.msra.mxu0 %v820_v11  ;;  %v815_v29 = vmul.f32 %v807_v24, %v783_v25 }
 0x52e   : > { %2179 = vmatprep.subr.mxu0 %v819_v15  ;;  %v814_v30 = vmul.f32 %v806_v27, %v782_v28 }
 0x52f   : > { %2180 = vmatpush3.msra.mxu0 %v819_v15 }
 0x530   : > { %2181 = vmatprep.subr.mxu0 %v818_v19 }
 0x531   : > { %2182 = vmatpush3.msra.mxu0 %v818_v19 }
 0x532   : > { %2183 = vmatprep.subr.mxu0 %v817_v23 }
 0x533   : > { %2184 = vmatpush3.msra.mxu0 %v817_v23 }
 0x534   : > { %2185 = vmatprep.subr.mxu0 %v816_v26 }
 0x535   : > { %2186 = vmatpush3.msra.mxu0 %v816_v26  ;;  %v1999_v26 = vld [vmem:[#allocation2 + $0x170] ss:$0 sm:$0xff] }
 0x536   : > { %2187 = vmatprep.subr.mxu0 %v815_v29 }
 0x537   : > { %2188 = vmatpush3.msra.mxu0 %v815_v29 }
 0x538   : > { %2189 = vmatprep.subr.mxu0 %v814_v30 }
 0x539   : > { %2190 = vmatpush3.msra.mxu0 %v814_v30 }
 0x53a   : > { %2192 = vmatmul.mubr.msk.f32.vlgmr.msra.gmra.mxu0 %vm824_vm4, %v823_v31  ;;  %2205 = vmatprep.subr.mxu0 %v1063_v8 }
 0x53b   : > { %2206 = vmatpush3.msra.mxu0 %v1063_v8  ;;  %v1196_v8 = vld [vmem:[#allocation2 + $0x198] sm:$0xff] }
 0x53c   : > { %2207 = vmatprep.subr.mxu0 %v1062_v9 }
 0x53d   : > { %2208 = vmatpush3.msra.mxu0 %v1062_v9  ;;  %v1197_v9 = vld [vmem:[#allocation2 + $0x1a0] sm:$0xff] }
 0x5fa   : > { %v2193_v32 = vpop.f32.mrf.mxu0 }
 0x5fb   : > { %v907_v33 = vadd.f32 %v2193_v32, %v2588_v43 }
 0x5fc   : > { %v897_v35 = vpop.f32.mrf.mxu0 }
 0x5fd   : > { %v2611_v36 = vadd.f32 %v918_v34, %v907_v33  ;;  %v906_v37 = vadd.f32 %v897_v35, %v2590_v45 }
 0x5ff   : > { %v2614_v39 = vadd.f32 %v913_v38, %v906_v37  ;;  %v927_v40 = vsel %vm557_vm3, %v2611_v36, 0.0 }
 0x600   : > { %928 = vadd.xlane.f32.xlu1 %v927_v40 }
 0x601   : > { %v924_v41 = vsel %vm557_vm3, %v2614_v39, 0.0 }
 0x602   : > { %925 = vadd.xlane.f32.xlu0 %v924_v41 }
 0x689   : > { %v929_v42 = vpop.xlane.xlu1 %928 }
 0x68a   : > { %v931_v44 = vmul.f32 0.03125, %v929_v42 }
 0x68b   : > { %v926_v43 = vpop.xlane.xlu0 %925 }
 0x68c   : > { %v930_v46 = vmul.f32 0.03125, %v926_v43  ;;  %v933_v47 = vsub.f32 %v2611_v36, %v931_v44  ;;  %v1209_v43 = vld [vmem:[#allocation2 + $0x200] sm:$0xff] }
 0x68e   : > { %v932_v48 = vsub.f32 %v2614_v39, %v930_v46  ;;  %v935_v50 = vmul.f32 %v933_v47, %v933_v47  ;;  %v1207_v46 = vld [vmem:[#allocation2 + $0x1f0] sm:$0xff] }
 0x690   : > { %v934_v45 = vmul.f32 %v932_v48, %v932_v48  ;;  %v939_v51 = vsel %vm557_vm3, %v935_v50, 0.0  ;;  %v1203_v50 = vld [vmem:[#allocation2 + $0x1d0] sm:$0xff] }
 0x692   : > { %v936_v49 = vsel %vm557_vm3, %v934_v45, 0.0  ;;  %v1205_v45 = vld [vmem:[#allocation2 + $0x1e0] sm:$0xff] }
 0x693   : > { %937 = vadd.xlane.f32.xlu0 %v936_v49  ;;  %v1204_v49 = vld [vmem:[#allocation2 + $0x1d8] sm:$0xff] }
 0x697   : > { %940 = vadd.xlane.f32.xlu0 %v939_v51  ;;  %v1202_v51 = vld [vmem:[#allocation2 + $0x1c8] sm:$0xff] }
 0x71c   : > { %v938_v56 = vpop.xlane.xlu0 %937 }
 0x71d   : > { %v942_v57 = vmul.f32 0.03125, %v938_v56 }
 0x71f   : > { %v944_v58 = vadd.f32 1e-05, %v942_v57 }
 0x720   : > { %v941_v59 = vpop.xlane.xlu0 %940 }
 0x721   : > { %2353 = vrsqrt.f32 %v944_v58  ;;  %v943_v60 = vmul.f32 0.03125, %v941_v59 }
 0x723   : > { %v945_v61 = vadd.f32 1e-05, %v943_v60 }
 0x725   : > { %2355 = vrsqrt.f32 %v945_v61 }
 0x72e   : > { %v2354_v62 = vpop.eup %2353 }
 0x72f   : > { %v948_v0 = vmul.f32 %v2354_v62, %v932_v48  ;;  %v1206_v48 = vld [vmem:[#allocation2 + $0x1e8] sm:$0xff]  ;;  %v2000_v62 = vld [vmem:[#allocation2 + $0x178] ss:$0 sm:$0xff] }
 0x731   : > { %v954_v2 = vmul.f32 %v1992_v63, %v948_v0 }
 0x732   : > { %v2356_v3 = vpop.eup %2355 }
 0x733   : > { %v949_v4 = vmul.f32 %v2356_v3, %v933_v47  ;;  %v960_v5 = vadd.f32 %v1993_v1, %v954_v2  ;;  %v1208_v47 = vld [vmem:[#allocation2 + $0x1f8] sm:$0xff] }
 0x735   : > { %v955_v6 = vmul.f32 %v1992_v63, %v949_v4  ;;  %2202 = vmatprep.mubr.msk.f32.mxu1 %vm557_vm3, %v960_v5 }
 0x737   : > { %v961_v7 = vadd.f32 %v1993_v1, %v955_v6  ;;  %v2001_v1 = vld [vmem:[#allocation2 + $0x180] ss:$0 sm:$0xff] }
 0x739   : > { %2203 = vmatmul.mubr.msk.f32.vlgmr.msra.gmra.mxu1 %vm557_vm3, %v961_v7  ;;  %v1195_v7 = vld [vmem:[#allocation2 + $0x190] sm:$0xff] }
 0x73a   : > { %2216 = vmatprep.mubr.msk.f32.mxu1 %vm286_vm2, %v1194_v54 }
 0x7f9   : > { %v2204_v11 = vpop.f32.mrf.mxu1 }
 0x7fa   : > { %v1049_v12 = vadd.f32 %v2204_v11, %v1994_v10  ;;  %v1199_v11 = vld [vmem:[#allocation2 + $0x1b0] sm:$0xff] }
 0x7fb   : > { %v1043_v13 = vpop.f32.mrf.mxu1 }
 0x7fc   : > { %v1055_v14 = vmul.f32 0.70710677, %v1049_v12  ;;  %v1044_v15 = vadd.f32 %v1994_v10, %v1043_v13  ;;  %v1053_v22 = vmul.f32 0.5, %v1049_v12  ;;  %v1198_v10 = vld [vmem:[#allocation2 + $0x1a8] sm:$0xff]  ;;  %v1200_v12 = vld [vmem:[#allocation2 + $0x1b8] sm:$0xff]  ;;  %v1201_v13 = vld [vmem:[#allocation2 + $0x1c0] sm:$0xff] }
 0x7fe   : > { %2357 = verf.f32 %v1055_v14  ;;  %v1054_v16 = vmul.f32 0.70710677, %v1044_v15  ;;  %v1052_v20 = vmul.f32 0.5, %v1044_v15  ;;  %v1419_v14 = vld [vmem:[#allocation2 + $0x208] sm:$0xff] }
 0x800   : > { %2359 = verf.f32 %v1054_v16 }
 0x80b   : > { %v2358_v17 = vpop.eup %2357 }
 0x80c   : > { %v1059_v19 = vadd.f32 1.0, %v2358_v17 }
 0x80d   : > { %v2360_v18 = vpop.eup %2359 }
 0x80e   : > { %v1058_v21 = vadd.f32 1.0, %v2360_v18  ;;  %v1061_v24 = vmul.f32 %v1059_v19, %v1053_v22 }
 0x810   : > { %v1060_v23 = vmul.f32 %v1058_v21, %v1052_v20 }
 0x812   : > { %2209 = vmatprep.mubr.msk.f32.mxu0 %vm286_vm2, %v1060_v23 }
 0x813   : > { %2210 = vmatmul.mubr.msk.f32.vlgmr.msra.gmra.mxu0 %vm286_vm2, %v1061_v24 }
 0x814   : > { %2244 = vmatprep.mubr.msk.f32.mxu0 %vm824_vm4, %v1419_v14 }
 0x8d3   : > { %v2211_v25 = vpop.f32.mrf.mxu0 }
 0x8d4   : > { %v1146_v27 = vadd.f32 %v2211_v25, %v2611_v36 }
 0x8d5   : > { %v1136_v28 = vpop.f32.mrf.mxu0 }
 0x8d6   : > { %v2629_v29 = vadd.f32 %v1999_v26, %v1146_v27  ;;  %v1145_v30 = vadd.f32 %v1136_v28, %v2614_v39 }
 0x8d8   : > { %v2632_v31 = vadd.f32 %v1999_v26, %v1145_v30  ;;  %v1159_v32 = vsel %vm557_vm3, %v2629_v29, 0.0 }
 0x8d9   : > { %1160 = vadd.xlane.f32.xlu1 %v1159_v32 }
 0x8da   : > { %v1156_v33 = vsel %vm557_vm3, %v2632_v31, 0.0 }
 0x8db   : > { %1157 = vadd.xlane.f32.xlu0 %v1156_v33 }
 0x962   : > { %v1161_v34 = vpop.xlane.xlu1 %1160 }
 0x963   : > { %v1163_v35 = vmul.f32 0.03125, %v1161_v34 }
 0x964   : > { %v1158_v37 = vpop.xlane.xlu0 %1157 }
 0x965   : > { %v1165_v36 = vsub.f32 %v2629_v29, %v1163_v35  ;;  %v1162_v38 = vmul.f32 0.03125, %v1158_v37 }
 0x967   : > { %v1164_v40 = vsub.f32 %v2632_v31, %v1162_v38  ;;  %v1167_v41 = vmul.f32 %v1165_v36, %v1165_v36 }
 0x969   : > { %v1171_v39 = vsel %vm557_vm3, %v1167_v41, 0.0  ;;  %v1166_v42 = vmul.f32 %v1164_v40, %v1164_v40 }
 0x96a   : > { %1172 = vadd.xlane.f32.xlu1 %v1171_v39 }
 0x96b   : > { %v1168_v44 = vsel %vm557_vm3, %v1166_v42, 0.0 }
 0x96c   : > { %1169 = vadd.xlane.f32.xlu0 %v1168_v44 }
 0x97b   : > { %1247 = vperm.xlu1 %2332, %v1209_v43  }
 0x97f   : > { %1237 = vperm.xlu1 %2332, %v1207_v46  }
 0x982   : > { %1242 = vperm.xlu0 %2331, %v1208_v47  }
 0x983   : > { %1232 = vperm.xlu1 %2332, %v1206_v48  }
 0x986   : > { %1227 = vperm.xlu0 %2331, %v1205_v45  }
 0x987   : > { %1222 = vperm.xlu1 %2332, %v1204_v49  }
 0x98a   : > { %1217 = vperm.xlu0 %2331, %v1203_v50  }
 0x98b   : > { %1212 = vperm.xlu1 %2332, %v1202_v51  }
 0x98e   : > { %1508 = vperm.xlu0 %2331, %v1504_v52  }
 0x98f   : > { %1513 = vperm.xlu1 %2332, %v1505_v53  }
 0x9f3   : > { %v1173_v55 = vpop.xlane.xlu1 %1172 }
 0x9f4   : > { %v1175_v56 = vmul.f32 0.03125, %v1173_v55 }
 0x9f5   : > { %v1170_v57 = vpop.xlane.xlu0 %1169 }
 0x9f6   : > { %v1177_v58 = vadd.f32 1e-05, %v1175_v56  ;;  %v1174_v59 = vmul.f32 0.03125, %v1170_v57 }
 0x9f7   : > { %v1248_v15 = vpop.permute.xlu1 %1247 }
 0x9f8   : > { %2361 = vrsqrt.f32 %v1177_v58  ;;  %v1176_v60 = vadd.f32 1e-05, %v1174_v59 }
 0x9fa   : > { %2363 = vrsqrt.f32 %v1176_v60 }
 0x9fb   : > { %v1238_v16 = vpop.permute.xlu1 %1237 }
 0x9fd   : > { %v1243_v19 = vpop.permute.xlu0 %1242 }
 0x9ff   : > { %v1233_v21 = vpop.permute.xlu1 %1232 }
 0xa01   : > { %v1228_v25 = vpop.permute.xlu0 %1227 }
 0xa03   : > { %v1223_v28 = vpop.permute.xlu1 %1222 }
 0xa05   : > { %v2362_v61 = vpop.eup %2361  ;;  %v1218_v41 = vpop.permute.xlu0 %1217 }
 0xa06   : > { %v1181_v63 = vmul.f32 %v2362_v61, %v1165_v36 }
 0xa07   : > { %v2364_v0 = vpop.eup %2363  ;;  %v1213_v43 = vpop.permute.xlu1 %1212 }
 0xa08   : > { %v1187_v2 = vmul.f32 %v2000_v62, %v1181_v63  ;;  %v1180_v3 = vmul.f32 %v2364_v0, %v1164_v40 }
 0xa0a   : > { %v1193_v4 = vadd.f32 %v2001_v1, %v1187_v2  ;;  %v1186_v5 = vmul.f32 %v2000_v62, %v1180_v3 }
 0xa0c   : > { %2212 = vmatprep.subr.mxu1 %v1193_v4  ;;  %v1192_v6 = vadd.f32 %v2001_v1, %v1186_v5 }
 0xa0d   : > { %2213 = vmatpush3.msra.mxu1 %v1193_v4 }
 0xa0e   : > { %2214 = vmatprep.subr.mxu1 %v1192_v6 }
 0xa0f   : > { %2215 = vmatpush3.msra.mxu1 %v1192_v6 }
 0xa10   : > { %2217 = vmatmul.mubr.msk.f32.vlgmr.msra.gmra.mxu1 %vm286_vm2, %v1195_v7 }
 0xa11   : > { %2219 = vmatprep.mubr.msk.f32.mxu1 %vm286_vm2, %v1196_v8 }
 0xa14   : > { %2220 = vmatmul.mubr.msk.f32.gmra.mxu1 %vm286_vm2, %v1197_v9 }
 0xa15   : > { %2222 = vmatprep.mubr.msk.f32.mxu1 %vm286_vm2, %v1198_v10 }
 0xa18   : > { %2223 = vmatmul.mubr.msk.f32.gmra.mxu1 %vm286_vm2, %v1199_v11 }
 0xa19   : > { %2225 = vmatprep.mubr.msk.f32.mxu1 %vm286_vm2, %v1200_v12 }
 0xa1c   : > { %2226 = vmatmul.mubr.msk.f32.gmra.mxu1 %vm286_vm2, %v1201_v13 }
 0xad0   : > { %v2218_v17 = vpop.f32.mrf.mxu1 }
 0xad1   : > { %v1346_v39 = vadd.f32 %v2218_v17, %v1218_v41  ;;  %v1420_v17 = vld [vmem:[#allocation2 + $0x210] sm:$0xff]  ;;  %v1559_v41 = vld [vmem:[#allocation2 + $0x240] sm:$0xff] }
 0xad2   : > { %v1340_v18 = vpop.f32.mrf.mxu1 }
 0xad3   : > { %v1341_v46 = vadd.f32 %v1340_v18, %v1213_v43  ;;  %v1388_v48 = vmul.f32 0.70710677, %v1346_v39  ;;  %v1380_v11 = vmul.f32 0.5, %v1346_v39  ;;  %v1558_v39 = vld [vmem:[#allocation2 + $0x238] sm:$0xff] }
 0xad4   : > { %v2221_v20 = vpop.f32.mrf.mxu1 }
 0xad5   : > { %v1356_v33 = vadd.f32 %v2221_v20, %v1228_v25  ;;  %v1387_v45 = vmul.f32 0.70710677, %v1341_v46  ;;  %v1379_v14 = vmul.f32 0.5, %v1341_v46  ;;  %v1514_v20 = vpop.permute.xlu1 %1513 }
 0xad6   : > { %v1350_v22 = vpop.f32.mrf.mxu1 }
 0xad7   : > { %v1351_v36 = vadd.f32 %v1350_v22, %v1223_v28  ;;  %v1390_v42 = vmul.f32 0.70710677, %v1356_v33  ;;  %v1382_v4 = vmul.f32 0.5, %v1356_v33 }
 0xad8   : > { %v2224_v23 = vpop.f32.mrf.mxu1 }
 0xad9   : > { %v1366_v24 = vadd.f32 %v2224_v23, %v1238_v16  ;;  %v1389_v47 = vmul.f32 0.70710677, %v1351_v36  ;;  %v1381_v8 = vmul.f32 0.5, %v1351_v36 }
 0xada   : > { %v1360_v26 = vpop.f32.mrf.mxu1 }
 0xadb   : > { %v1361_v27 = vadd.f32 %v1360_v26, %v1233_v21  ;;  %v1392_v30 = vmul.f32 0.70710677, %v1366_v24  ;;  %v1384_v60 = vmul.f32 0.5, %v1366_v24  ;;  %v1509_v24 = vpop.permute.xlu0 %1508 }
 0xadc   : > { %v2227_v32 = vpop.f32.mrf.mxu1 }
 0xadd   : > { %v1376_v34 = vadd.f32 %v2227_v32, %v1248_v15  ;;  %v1391_v35 = vmul.f32 0.70710677, %v1361_v27  ;;  %2365 = verf.f32 %v1392_v30  ;;  %v1383_v0 = vmul.f32 0.5, %v1361_v27 }
 0xade   : > { %v1370_v37 = vpop.f32.mrf.mxu1 }
 0xadf   : > { %v1394_v38 = vmul.f32 0.70710677, %v1376_v34  ;;  %v1371_v40 = vadd.f32 %v1370_v37, %v1243_v19  ;;  %v1386_v52 = vmul.f32 0.5, %v1376_v34 }
 0xae1   : > { %2367 = verf.f32 %v1394_v38  ;;  %v1393_v44 = vmul.f32 0.70710677, %v1371_v40  ;;  %v1385_v55 = vmul.f32 0.5, %v1371_v40  ;;  %v1561_v38 = vld [vmem:[#allocation2 + $0x250] sm:$0xff]  ;;  %v1560_v40 = vld [vmem:[#allocation2 + $0x248] sm:$0xff] }
 0xae2   : > { %2369 = verf.f32 %v1391_v35  ;;  %2247 = vmatprep.subr.mxu1 %v1561_v38 }
 0xae3   : > { %2371 = verf.f32 %v1393_v44  ;;  %2248 = vmatpush3.msra.mxu1 %v1561_v38 }
 0xae4   : > { %2373 = verf.f32 %v1390_v42  ;;  %2249 = vmatprep.subr.mxu1 %v1560_v40 }
 0xae5   : > { %2375 = verf.f32 %v1389_v47  ;;  %2250 = vmatpush3.msra.mxu1 %v1560_v40 }
 0xae6   : > { %2377 = verf.f32 %v1388_v48  ;;  %2251 = vmatprep.subr.mxu1 %v1559_v41 }
 0xae7   : > { %2379 = verf.f32 %v1387_v45  ;;  %2252 = vmatpush3.msra.mxu1 %v1559_v41 }
 0xae8   : > { %2253 = vmatprep.subr.mxu1 %v1558_v39 }
 0xae9   : > { %2254 = vmatpush3.msra.mxu1 %v1558_v39 }
 0xaea   : > { %v2366_v49 = vpop.eup %2365 }
 0xaeb   : > { %v1408_v58 = vadd.f32 1.0, %v2366_v49  ;;  %v2012_v49 = vld [vmem:[#allocation2 + $0x228] ss:$0 sm:$0xff] }
 0xaed   : > { %v1416_v1 = vmul.f32 %v1408_v58, %v1384_v60  ;;  %v1659_v58 = vld [vmem:[#allocation2 + $0x268] sm:$0xff]  ;;  %v2014_v60 = vld [vmem:[#allocation2 + $0x258] ss:$0 sm:$0xff] }
 0xaee   : > { %v2368_v50 = vpop.eup %2367 }
 0xaef   : > { %v2370_v51 = vpop.eup %2369  ;;  %v1410_v53 = vadd.f32 1.0, %v2368_v50 }
 0xaf0   : > { %v2372_v54 = vpop.eup %2371  ;;  %v1407_v62 = vadd.f32 1.0, %v2370_v51  ;;  %v2013_v51 = vld [vmem:[#allocation2 + $0x230] ss:$0 sm:$0xff] }
 0xaf1   : > { %v1418_v56 = vmul.f32 %v1410_v53, %v1386_v52  ;;  %v1409_v57 = vadd.f32 1.0, %v2372_v54  ;;  %v2374_v59 = vpop.eup %2373 }
 0xaf2   : > { %v2376_v63 = vpop.eup %2375  ;;  %v1406_v2 = vadd.f32 1.0, %v2374_v59  ;;  %v1415_v5 = vmul.f32 %v1407_v62, %v1383_v0  ;;  %v1658_v59 = vld [vmem:[#allocation2 + $0x260] sm:$0xff] }
 0xaf3   : > { %2228 = vmatprep.subr.mxu0 %v1418_v56  ;;  %v1417_v61 = vmul.f32 %v1409_v57, %v1385_v55  ;;  %v2378_v3 = vpop.eup %2377  ;;  %v1405_v6 = vadd.f32 1.0, %v2376_v63 }
 0xaf4   : > { %2229 = vmatpush3.msra.mxu0 %v1418_v56  ;;  %v2380_v7 = vpop.eup %2379  ;;  %v1414_v9 = vmul.f32 %v1406_v2, %v1382_v4  ;;  %v1404_v10 = vadd.f32 1.0, %v2378_v3 }
 0xaf5   : > { %2230 = vmatprep.subr.mxu0 %v1417_v61  ;;  %v1413_v12 = vmul.f32 %v1405_v6, %v1381_v8  ;;  %v1403_v13 = vadd.f32 1.0, %v2380_v7 }
 0xaf6   : > { %2231 = vmatpush3.msra.mxu0 %v1417_v61  ;;  %v1412_v15 = vmul.f32 %v1404_v10, %v1380_v11 }
 0xaf7   : > { %2232 = vmatprep.subr.mxu0 %v1416_v1  ;;  %v1411_v16 = vmul.f32 %v1403_v13, %v1379_v14 }
 0xaf8   : > { %2233 = vmatpush3.msra.mxu0 %v1416_v1 }
 0xaf9   : > { %2234 = vmatprep.subr.mxu0 %v1415_v5 }
 0xafa   : > { %2235 = vmatpush3.msra.mxu0 %v1415_v5 }
 0xafb   : > { %2236 = vmatprep.subr.mxu0 %v1414_v9 }
 0xafc   : > { %2237 = vmatpush3.msra.mxu0 %v1414_v9 }
 0xafd   : > { %2238 = vmatprep.subr.mxu0 %v1413_v12 }
 0xafe   : > { %2239 = vmatpush3.msra.mxu0 %v1413_v12  ;;  %v2019_v12 = vld [vmem:[#allocation2 + $0x270] ss:$0 sm:$0xff] }
 0xaff   : > { %2240 = vmatprep.subr.mxu0 %v1412_v15 }
 0xb00   : > { %2241 = vmatpush3.msra.mxu0 %v1412_v15 }
 0xb01   : > { %2242 = vmatprep.subr.mxu0 %v1411_v16 }
 0xb02   : > { %2243 = vmatpush3.msra.mxu0 %v1411_v16 }
 0xb03   : > { %2245 = vmatmul.mubr.msk.f32.vlgmr.msra.gmra.mxu0 %vm824_vm4, %v1420_v17  ;;  %2258 = vmatprep.subr.mxu0 %v1659_v58 }
 0xb04   : > { %2259 = vmatpush3.msra.mxu0 %v1659_v58 }
 0xb05   : > { %2260 = vmatprep.subr.mxu0 %v1658_v59 }
 0xb06   : > { %2261 = vmatpush3.msra.mxu0 %v1658_v59 }
 0xbc3   : > { %v2246_v18 = vpop.f32.mrf.mxu0 }
 0xbc4   : > { %v1503_v19 = vadd.f32 %v2246_v18, %v2629_v29 }
 0xbc5   : > { %v1493_v21 = vpop.f32.mrf.mxu0 }
 0xbc6   : > { %v2653_v22 = vadd.f32 %v1514_v20, %v1503_v19  ;;  %v1502_v23 = vadd.f32 %v1493_v21, %v2632_v31 }
 0xbc8   : > { %v2656_v25 = vadd.f32 %v1509_v24, %v1502_v23  ;;  %v1523_v26 = vsel %vm557_vm3, %v2653_v22, 0.0 }
 0xbc9   : > { %1524 = vadd.xlane.f32.xlu1 %v1523_v26 }
 0xbca   : > { %v1520_v27 = vsel %vm557_vm3, %v2656_v25, 0.0 }
 0xbcb   : > { %1521 = vadd.xlane.f32.xlu0 %v1520_v27 }
 0xc52   : > { %v1525_v28 = vpop.xlane.xlu1 %1524 }
 0xc53   : > { %v1527_v30 = vmul.f32 0.03125, %v1525_v28 }
 0xc54   : > { %v1522_v29 = vpop.xlane.xlu0 %1521 }
 0xc55   : > { %v1526_v32 = vmul.f32 0.03125, %v1522_v29  ;;  %v1529_v33 = vsub.f32 %v2653_v22, %v1527_v30  ;;  %v1804_v29 = vld [vmem:[#allocation2 + $0x2a0] sm:$0xff] }
 0xc57   : > { %v1528_v34 = vsub.f32 %v2656_v25, %v1526_v32  ;;  %v1531_v37 = vmul.f32 %v1529_v33, %v1529_v33  ;;  %v2489_v32 = vmov 0.0  }
 0xc58   : > { %2265 = vmatprep.subr.mxu1 %v2489_v32 }
 0xc59   : > { %v1530_v31 = vmul.f32 %v1528_v34, %v1528_v34  ;;  %v1535_v36 = vsel %vm557_vm3, %v1531_v37, 0.0 }
 0xc5b   : > { %v1532_v35 = vsel %vm557_vm3, %v1530_v31, 0.0  ;;  %v1801_v31 = vld [vmem:[#allocation2 + $0x288] sm:$0xff] }
 0xc5c   : > { %1533 = vadd.xlane.f32.xlu0 %v1532_v35 }
 0xc60   : > { %1536 = vadd.xlane.f32.xlu0 %v1535_v36 }
 0xce5   : > { %v1534_v42 = vpop.xlane.xlu0 %1533 }
 0xce6   : > { %v1538_v44 = vmul.f32 0.03125, %v1534_v42  ;;  %v2020_v42 = vld [vmem:[#allocation2 + $0x278] ss:$0 sm:$0xff] }
 0xce8   : > { %v1540_v43 = vadd.f32 1e-05, %v1538_v44 }
 0xce9   : > { %v1537_v46 = vpop.xlane.xlu0 %1536 }
 0xcea   : > { %2381 = vrsqrt.f32 %v1540_v43  ;;  %v1539_v47 = vmul.f32 0.03125, %v1537_v46  ;;  %v2021_v46 = vld [vmem:[#allocation2 + $0x280] ss:$0 sm:$0xff] }
 0xcec   : > { %v1541_v48 = vadd.f32 1e-05, %v1539_v47 }
 0xcee   : > { %2383 = vrsqrt.f32 %v1541_v48 }
 0xcf7   : > { %v2382_v45 = vpop.eup %2381 }
 0xcf8   : > { %v1544_v50 = vmul.f32 %v2382_v45, %v1528_v34  ;;  %v1802_v34 = vld [vmem:[#allocation2 + $0x290] sm:$0xff] }
 0xcfa   : > { %v1550_v52 = vmul.f32 %v2012_v49, %v1544_v50 }
 0xcfb   : > { %v2384_v53 = vpop.eup %2383 }
 0xcfc   : > { %v1545_v54 = vmul.f32 %v2384_v53, %v1529_v33  ;;  %v1556_v55 = vadd.f32 %v2013_v51, %v1550_v52  ;;  %v1803_v33 = vld [vmem:[#allocation2 + $0x298] sm:$0xff] }
 0xcfe   : > { %v1551_v56 = vmul.f32 %v2012_v49, %v1545_v54  ;;  %2255 = vmatprep.mubr.msk.f32.mxu1 %vm557_vm3, %v1556_v55 }
 0xd00   : > { %v1557_v57 = vadd.f32 %v2013_v51, %v1551_v56 }
 0xd02   : > { %2256 = vmatmul.mubr.msk.f32.vlgmr.msra.gmra.mxu1 %vm557_vm3, %v1557_v57 }
 0xd03   : > { %2273 = vmatprep.mubr.msk.f32.mxu1 %vm2490_vm5, %v2489_v32  ;;  %2266 = vmatpush3.msra.mxu1 %v1804_v29 }
 0xd04   : > { %2267 = vmatprep.subr.mxu1 %v2489_v32 }
 0xd05   : > { %2268 = vmatpush3.msra.mxu1 %v1803_v33 }
 0xd06   : > { %2269 = vmatprep.subr.mxu1 %v2489_v32 }
 0xd07   : > { %2270 = vmatpush3.msra.mxu1 %v1802_v34 }
 0xd08   : > { %2271 = vmatprep.subr.mxu1 %v2489_v32 }
 0xd09   : > { %2272 = vmatpush3.msra.mxu1 %v1801_v31 }
 0xdc2   : > { %v2257_v61 = vpop.f32.mrf.mxu1 }
 0xdc3   : > { %v1645_v62 = vadd.f32 %v2257_v61, %v2014_v60  ;;  %v1805_v61 = vld [vmem:[#allocation2 + $0x2a8] sm:$0x1] }
 0xdc4   : > { %v1639_v63 = vpop.f32.mrf.mxu1 }
 0xdc5   : > { %v1651_v0 = vmul.f32 0.70710677, %v1645_v62  ;;  %v1640_v1 = vadd.f32 %v2014_v60, %v1639_v63  ;;  %v1649_v8 = vmul.f32 0.5, %v1645_v62 }
 0xdc7   : > { %2385 = verf.f32 %v1651_v0  ;;  %v1650_v2 = vmul.f32 0.70710677, %v1640_v1  ;;  %v1648_v6 = vmul.f32 0.5, %v1640_v1 }
 0xdc9   : > { %2387 = verf.f32 %v1650_v2 }
 0xdd4   : > { %v2386_v3 = vpop.eup %2385 }
 0xdd5   : > { %v1655_v5 = vadd.f32 1.0, %v2386_v3 }
 0xdd6   : > { %v2388_v4 = vpop.eup %2387 }
 0xdd7   : > { %v1654_v7 = vadd.f32 1.0, %v2388_v4  ;;  %v1657_v10 = vmul.f32 %v1655_v5, %v1649_v8 }
 0xdd9   : > { %v1656_v9 = vmul.f32 %v1654_v7, %v1648_v6 }
 0xddb   : > { %2262 = vmatprep.mubr.msk.f32.mxu0 %vm286_vm2, %v1656_v9 }
 0xddc   : > { %2263 = vmatmul.mubr.msk.f32.vlgmr.msra.gmra.mxu0 %vm286_vm2, %v1657_v10 }
 0xe9c   : > { %v2264_v11 = vpop.f32.mrf.mxu0 }
 0xe9d   : > { %v1742_v13 = vadd.f32 %v2264_v11, %v2653_v22 }
 0xe9e   : > { %v1732_v14 = vpop.f32.mrf.mxu0 }
 0xe9f   : > { %v1741_v15 = vadd.f32 %v1732_v14, %v2656_v25  ;;  %v1749_v16 = vadd.f32 %v2019_v12, %v1742_v13 }
 0xea1   : > { %v1755_v17 = vsel %vm557_vm3, %v1749_v16, 0.0  ;;  %v1748_v18 = vadd.f32 %v2019_v12, %v1741_v15 }
 0xea2   : > { %1756 = vadd.xlane.f32.xlu0 %v1755_v17 }
 0xea3   : > { %v1752_v19 = vsel %vm557_vm3, %v1748_v18, 0.0 }
 0xea4   : > { %1753 = vadd.xlane.f32.xlu1 %v1752_v19 }
 0xf2b   : > { %v1757_v20 = vpop.xlane.xlu0 %1756 }
 0xf2c   : > { %v1759_v21 = vmul.f32 0.03125, %v1757_v20 }
 0xf2d   : > { %v1754_v23 = vpop.xlane.xlu1 %1753 }
 0xf2e   : > { %v1761_v24 = vsub.f32 %v1749_v16, %v1759_v21  ;;  %v1758_v26 = vmul.f32 0.03125, %v1754_v23 }
 0xf30   : > { %v1760_v27 = vsub.f32 %v1748_v18, %v1758_v26  ;;  %v1763_v28 = vmul.f32 %v1761_v24, %v1761_v24 }
 0xf32   : > { %v1767_v22 = vsel %vm557_vm3, %v1763_v28, 0.0  ;;  %v1762_v30 = vmul.f32 %v1760_v27, %v1760_v27 }
 0xf33   : > { %1768 = vadd.xlane.f32.xlu0 %v1767_v22 }
 0xf34   : > { %v1764_v25 = vsel %vm557_vm3, %v1762_v30, 0.0 }
 0xf35   : > { %1765 = vadd.xlane.f32.xlu1 %v1764_v25 }
 0xfbc   : > { %v1769_v35 = vpop.xlane.xlu0 %1768 }
 0xfbd   : > { %v1771_v37 = vmul.f32 0.03125, %v1769_v35 }
 0xfbe   : > { %v1766_v36 = vpop.xlane.xlu1 %1765 }
 0xfbf   : > { %v1773_v38 = vadd.f32 1e-05, %v1771_v37  ;;  %v1770_v40 = vmul.f32 0.03125, %v1766_v36 }
 0xfc1   : > { %2389 = vrsqrt.f32 %v1773_v38  ;;  %v1772_v41 = vadd.f32 1e-05, %v1770_v40 }
 0xfc3   : > { %2391 = vrsqrt.f32 %v1772_v41 }
 0xfce   : > { %v2390_v39 = vpop.eup %2389 }
 0xfcf   : > { %v1777_v44 = vmul.f32 %v2390_v39, %v1761_v24 }
 0xfd0   : > { %v2392_v43 = vpop.eup %2391 }
 0xfd1   : > { %v1783_v47 = vmul.f32 %v2020_v42, %v1777_v44  ;;  %v1776_v48 = vmul.f32 %v2392_v43, %v1760_v27 }
 0xfd3   : > { %v1789_v45 = vadd.f32 %v2021_v46, %v1783_v47  ;;  %v1782_v49 = vmul.f32 %v2020_v42, %v1776_v48 }
 0xfd5   : > { %v1788_v50 = vadd.f32 %v2021_v46, %v1782_v49  ;;  %v1791_v52 = vsel %vm557_vm3, %v1789_v45, 0.0 }
 0xfd7   : > { %v1790_v51 = vsel %vm557_vm3, %v1788_v50, 0.0 }
 0xfd8   : > { %v1792_v53 = vadd.f32 %v1791_v52, %v1790_v51 }
 0xfda   : > { %v1793_v54 = vrot.slane %v1792_v53, 4 }
 0xfdc   : > { %v1794_v55 = vadd.f32 %v1793_v54, %v1792_v53 }
 0xfde   : > { %v1795_v56 = vrot.slane %v1794_v55, 2 }
 0xfe0   : > { %v1796_v57 = vadd.f32 %v1795_v56, %v1794_v55 }
 0xfe2   : > { %v1797_v58 = vrot.slane %v1796_v57, 1 }
 0xfe4   : > { %v1798_v59 = vadd.f32 %v1797_v58, %v1796_v57 }
 0xfe6   : > { %v1800_v60 = vmul.f32 0.0625, %v1798_v59 }
 0xfe8   : > { %2274 = vmatmul.mubr.msk.f32.vlgmr.msra.gmra.mxu1 %vm557_vm3, %v1800_v60 }
0x10a8   : > { %v1875_v62 = vpop.f32.mrf.mxu1 }
0x10a9   : > { %v1876_v63 = vadd.f32 %v1875_v62, %v1805_v61 }
0x10aa   : > { %v2275_v0 = vpop.f32.mrf.mxu1 }
0x10ab   : > { %1879 = vst [vmem:[%s150_s8] sm:$0x1] %v1876_v63 }
0x10ac   : > { %2432 = shalt.err (!%p2429_p0)
}
0x10ad   : > { %s2433_s26 = scalar_lea.hbm %s2684_s21, 16  ;;  %s2437_s29 = scalar_lea.hbm %s2721_s2, 32 }
0x10ae   : > { %p2434_p1 = scmp.ne.s32.totalorder %s2684_s21, %s2433_s26  ;;  %p2438_p4 = scmp.lt.s32.totalorder %s2684_s21, %s2721_s2 }
0x10af   : > { %p2439_p7 = scmp.lt.s32.totalorder %s2437_s29, %s2433_s26 }
0x10b0   : > { %p2435_p2 = pnand %p2434_p1, %p2545_p5 }
0x10b1   : > { %p2440_p8 = por %p2439_p7, %p2438_p4 }
0x10b2   : > { %p2436_p3 = pneg %p2435_p2 }
0x10b4   : > { %p2441_p6 = pnand %p2440_p8, %p2436_p3 }
0x10b6   : > { %2444 = shalt.err (!%p2441_p6)
}
0x10b7   : > { %2280 = dma.vmem_to_hbm [thread:$0]  (%p2545_p5), %s1894_s14, 16, %s2684_s21, %s1881_s22  }
0x10b8 PF: > { %p2292_p9 = scmp.ge.s32.totalorder %s2483_s12, 2  ;;  %s1905_s4 = sand.u32 1, %s2471_s9  }
0x10b9   : > { %p2725_p10 = scmp.ne.s32.totalorder %s2723_s20, 0  ;;  %s1906_s5 = scalar_lea.sflag [#allocation4], %s1905_s4 }
0x10bb   : > { %p2287_p11 = pnand %p2292_p9, %p2725_p10 }
0x10bd   : > { %p2288_p12 = pneg %p2287_p11 }
0x10bf   : > { %2466 = dma.done.wait (%p2288_p12), %s1906_s5, 16  }
0x10c0   : > { %2468 = vsyncadd (%p2288_p12), %s1906_s5, 4294967280  ;;  %p13_p13 = scmp.ge.s32.totalorder %s2532_s15, 4   ;;  %s2726_s9 = smov %s2475_s10 }
0x10c1   : > { %s2727_s10 = smov %s2479_s11  ;;  %s2728_s11 = smov %s2543_s18 }
0x10c2   : > { %s2729_s12 = smov %s2532_s15  ;;  %15 = sbr.rel (!%p13_p13) target bundleno = 4 (0x4), region = 68 }
0x10c7   :  { %1910 = vsyncpa [#allocation3], 1 }
0x10c8   :  { %1912 = vsyncpa [#allocation3 + $0x1], 1 }
0x10c9   :  { %1913 = vsyncpa [#allocation4], 1 }
0x10ca   :  { %1915 = vsyncpa [#allocation4 + $0x1], 1 }

</bundles_post_ra>
